<compile_context>
chip_gen: v5e
topology: v5e:2x2
jax: 0.10.0
libtpu: 0.0.40
codegen_flags: <defaults>
</compile_context>

<pallas_src>
import jax
import jax.numpy as jnp
from jax import lax
from jax.experimental import pallas as pl
from jax.experimental.pallas import tpu as pltpu


def _make_kernel(seq_len, batch, hidden):
    H = hidden
    G = 4 * H

    def kernel(x_ref, wih0_ref, b0_ref, wa_ref, whh1_ref, b1_ref,
               wreg_ref, breg_ref, out_ref):
        # ---- hoisted weight / bias loads (weights bf16, biases f32) ----
        wa = wa_ref[...]            # (H, 8H) bf16: [wih1_t | whh0_t]
        whh1 = whh1_ref[...]        # (H, 4H) bf16
        b1 = jnp.broadcast_to(b1_ref[...], (batch, G))          # f32

        # Layer-0 input projection for every timestep in one matmul (+ bias),
        # entirely off the serial recurrence critical path.
        xg0 = (jnp.dot(x_ref[...], wih0_ref[...],
                       preferred_element_type=jnp.float32)
               + jnp.broadcast_to(b0_ref[...], (seq_len * batch, G)))

        # Loop-carried state lives in vregs (no VMEM round-trips).
        zf = jnp.zeros((batch, H), jnp.float32)
        hrec0 = jnp.zeros((batch, G), jnp.float32)   # h0(t-1) @ whh0
        c0 = zf
        h1b = jnp.zeros((batch, H), jnp.bfloat16)    # h1(t-1), bf16 MXU operand
        c1 = zf

        h1_stash = []

        # Fully-unrolled time loop (seq_len small & static).
        for t in range(seq_len):
            lo = t * batch

            # ---- layer 0: no matmul here (recurrent term carried) ----
            g0 = xg0[lo:lo + batch, :] + hrec0
            s0 = jax.nn.sigmoid(g0)          # full-width EUP pass
            u0 = jnp.tanh(g0)                # full-width EUP pass
            c0 = s0[:, H:2 * H] * c0 + s0[:, 0:H] * u0[:, 2 * H:3 * H]
            h0 = s0[:, 3 * H:4 * H] * jnp.tanh(c0)
            h0b = h0.astype(jnp.bfloat16)

            # ---- fused MXU pass: layer-1 gates(t) + layer-0 recurrence(t+1)
            # Two independent pushes (both operands ready), no lane concat.
            da = jnp.dot(h0b, wa, preferred_element_type=jnp.float32)   # (B,8H)
            db = jnp.dot(h1b, whh1, preferred_element_type=jnp.float32) # (B,4H)
            hrec0 = da[:, G:2 * G]           # h0(t) @ whh0, for step t+1

            g1 = da[:, 0:G] + db + b1
            s1 = jax.nn.sigmoid(g1)
            u1 = jnp.tanh(g1)
            c1 = s1[:, H:2 * H] * c1 + s1[:, 0:H] * u1[:, 2 * H:3 * H]
            h1 = s1[:, 3 * H:4 * H] * jnp.tanh(c1)
            h1b = h1.astype(jnp.bfloat16)

            h1_stash.append(h1)              # stays in vregs

        # ---- regression head: one lane-dense matmul + one unmasked store ----
        h1_all = jnp.concatenate(h1_stash, axis=0).astype(jnp.bfloat16)
        out_ref[...] = (jnp.dot(h1_all, wreg_ref[...],
                                preferred_element_type=jnp.float32)
                        + jnp.broadcast_to(breg_ref[...], out_ref.shape))

    return kernel


def lstm_reg_pallas(x, params):
    seq_len, batch, in_size = x.shape
    hidden = params["whh0_t"].shape[0]
    out_size = params["wreg_t"].shape[1]

    # --- alignment padding (pure wrapper-side glue) ---
    bp = max(8, ((batch + 7) // 8) * 8)          # sublane-pad batch to 8
    op = ((out_size + 127) // 128) * 128         # lane-pad head output to 128

    xp = jnp.zeros((seq_len, bp, in_size), jnp.float32).at[:, :batch, :].set(x)
    x2d = xp.reshape(seq_len * bp, in_size)

    # Fused RHS: columns [0:4H] = wih1_t (layer-1 x-path),
    #            columns [4H:8H] = whh0_t (layer-0 h-recurrence for t+1).
    wa = jnp.concatenate([params["wih1_t"], params["whh0_t"]], axis=1)

    wreg_pad = jnp.zeros((hidden, op), jnp.float32).at[:, :out_size].set(
        params["wreg_t"])
    breg_pad = jnp.zeros((1, op), jnp.float32).at[:, :out_size].set(
        params["breg"])

    bf16 = lambda a: a.astype(jnp.bfloat16)      # MXU operands only
    vmem = pl.BlockSpec(memory_space=pltpu.MemorySpace.VMEM)
    kernel = _make_kernel(seq_len, bp, hidden)

    y2d = pl.pallas_call(
        kernel,
        out_shape=jax.ShapeDtypeStruct((seq_len * bp, op), jnp.float32),
        in_specs=[vmem] * 8,
        out_specs=vmem,
    )(bf16(x2d),
      bf16(params["wih0_t"]), params["b0"],
      bf16(wa), bf16(params["whh1_t"]), params["b1"],
      bf16(wreg_pad), breg_pad)

    return y2d.reshape(seq_len, bp, op)[:, :batch, :out_size]


def lstm_reg_reference(x, params):
    """Pure-JAX f32 reference with identical semantics (for validation)."""
    hidden = params["whh0_t"].shape[0]
    batch = x.shape[1]

    def cell(x_t, h, c, wih_t, whh_t, b):
        gates = x_t @ wih_t + h @ whh_t + b
        i = jax.nn.sigmoid(gates[:, 0 * hidden:1 * hidden])
        f = jax.nn.sigmoid(gates[:, 1 * hidden:2 * hidden])
        g = jnp.tanh(gates[:, 2 * hidden:3 * hidden])
        o = jax.nn.sigmoid(gates[:, 3 * hidden:4 * hidden])
        c_new = f * c + i * g
        return o * jnp.tanh(c_new), c_new

    def step(carry, x_t):
        h0, c0, h1, c1 = carry
        h0, c0 = cell(x_t, h0, c0, params["wih0_t"], params["whh0_t"],
                      params["b0"])
        h1, c1 = cell(h0, h1, c1, params["wih1_t"], params["whh1_t"],
                      params["b1"])
        y = h1 @ params["wreg_t"] + params["breg"]
        return (h0, c0, h1, c1), y

    z = jnp.zeros((batch, hidden), jnp.float32)
    _, ys = lax.scan(step, (z, z, z, z), x)
    return ys


def init_params(key, input_size, hidden_size, output_size):
    k = 1.0 / jnp.sqrt(hidden_size)
    keys = jax.random.split(key, 10)

    def u(kk, shape):
        return jax.random.uniform(kk, shape, jnp.float32, -k, k)

    # PyTorch LSTM params: weight_ih_l{l} (4H, in), weight_hh_l{l} (4H, H),
    # bias_ih_l{l} (4H,), bias_hh_l{l} (4H,). Linear: weight (out, H), bias.
    wih0 = u(keys[0], (4 * hidden_size, input_size))
    whh0 = u(keys[1], (4 * hidden_size, hidden_size))
    bih0 = u(keys[2], (4 * hidden_size,))
    bhh0 = u(keys[3], (4 * hidden_size,))
    wih1 = u(keys[4], (4 * hidden_size, hidden_size))
    whh1 = u(keys[5], (4 * hidden_size, hidden_size))
    bih1 = u(keys[6], (4 * hidden_size,))
    bhh1 = u(keys[7], (4 * hidden_size,))
    wreg = u(keys[8], (output_size, hidden_size))
    breg = u(keys[9], (output_size,))

    return {
        "wih0_t": wih0.T, "whh0_t": whh0.T, "b0": (bih0 + bhh0)[None, :],
        "wih1_t": wih1.T, "whh1_t": whh1.T, "b1": (bih1 + bhh1)[None, :],
        "wreg_t": wreg.T, "breg": breg[None, :],
    }


if __name__ == "__main__":
    # Small shapes consistent with the module: lstm_reg(input_size=16,
    # hidden_size=32, output_size=60, num_layers=2), seq=8, batch=2.
    SEQ, BATCH, IN, HID, OUT = 8, 2, 16, 32, 60

    key = jax.random.PRNGKey(0)
    kx, kp = jax.random.split(key)
    x = jax.random.normal(kx, (SEQ, BATCH, IN), jnp.float32)
    params = init_params(kp, IN, HID, OUT)

    y = lstm_reg_pallas(x, params)
    y = jax.block_until_ready(y)

    y_ref = jax.block_until_ready(lstm_reg_reference(x, params))
    assert y.shape == (SEQ, BATCH, OUT), y.shape
    # Tolerance sized for deliberate bf16 MXU operands (single-pass MXU issue)
    # vs. the f32 reference; real bugs (gate order, state carry) show up as
    # O(0.1) errors, far above this bound.
    assert jnp.allclose(y, y_ref, atol=2e-2, rtol=2e-2), \
        float(jnp.max(jnp.abs(y - y_ref)))

    print("KERNEL_OK")
</pallas_src>

<mosaic_0001>
module attributes {stable_mosaic.version = 11 : i64} {
  func.func @kernel(%arg0: memref<64x16xbf16, #tpu.memory_space<vmem>>, %arg1: memref<16x128xbf16, #tpu.memory_space<vmem>>, %arg2: memref<1x128xf32, #tpu.memory_space<vmem>>, %arg3: memref<32x256xbf16, #tpu.memory_space<vmem>>, %arg4: memref<32x128xbf16, #tpu.memory_space<vmem>>, %arg5: memref<1x128xf32, #tpu.memory_space<vmem>>, %arg6: memref<32x128xbf16, #tpu.memory_space<vmem>>, %arg7: memref<1x128xf32, #tpu.memory_space<vmem>>, %arg8: memref<64x128xf32, #tpu.memory_space<vmem>>) attributes {dimension_semantics = [], scalar_prefetch = 0 : i64, scratch_operands = 0 : i64, tpu.core_type = #tpu.core_type<tc>} {
    %c0 = arith.constant 0 : index
    %c0_0 = arith.constant 0 : index
    %0 = vector.load %arg3[%c0, %c0_0] : memref<32x256xbf16, #tpu.memory_space<vmem>>, vector<32x256xbf16>
    %c0_1 = arith.constant 0 : index
    %c0_2 = arith.constant 0 : index
    %1 = vector.load %arg4[%c0_1, %c0_2] : memref<32x128xbf16, #tpu.memory_space<vmem>>, vector<32x128xbf16>
    %c0_3 = arith.constant 0 : index
    %c0_4 = arith.constant 0 : index
    %2 = vector.load %arg5[%c0_3, %c0_4] : memref<1x128xf32, #tpu.memory_space<vmem>>, vector<1x128xf32>
    %3 = vector.shape_cast %2 : vector<1x128xf32> to vector<1x128xf32>
    %4 = vector.broadcast %3 : vector<1x128xf32> to vector<8x128xf32>
    %c0_5 = arith.constant 0 : index
    %c0_6 = arith.constant 0 : index
    %5 = vector.load %arg0[%c0_5, %c0_6] : memref<64x16xbf16, #tpu.memory_space<vmem>>, vector<64x16xbf16>
    %c0_7 = arith.constant 0 : index
    %c0_8 = arith.constant 0 : index
    %6 = vector.load %arg1[%c0_7, %c0_8] : memref<16x128xbf16, #tpu.memory_space<vmem>>, vector<16x128xbf16>
    %cst = arith.constant dense<0.000000e+00> : vector<64x128xf32>
    %7 = tpu.matmul %5, %6, %cst {dimension_numbers = #tpu.dot_dimension_numbers<[1], [0], [0], [1], [0, 0, 1, 1], [], []>} : vector<64x16xbf16>, vector<16x128xbf16>, vector<64x128xf32> -> vector<64x128xf32>
    %c0_9 = arith.constant 0 : index
    %c0_10 = arith.constant 0 : index
    %8 = vector.load %arg2[%c0_9, %c0_10] : memref<1x128xf32, #tpu.memory_space<vmem>>, vector<1x128xf32>
    %9 = vector.shape_cast %8 : vector<1x128xf32> to vector<1x128xf32>
    %10 = vector.broadcast %9 : vector<1x128xf32> to vector<64x128xf32>
    %11 = arith.addf %7, %10 : vector<64x128xf32>
    %cst_11 = arith.constant 0.000000e+00 : f32
    %12 = vector.broadcast %cst_11 : f32 to vector<8x32xf32>
    %cst_12 = arith.constant 0.000000e+00 : f32
    %13 = vector.broadcast %cst_12 : f32 to vector<8x128xf32>
    %cst_13 = arith.constant 0.000000e+00 : bf16
    %14 = vector.broadcast %cst_13 : bf16 to vector<8x32xbf16>
    %15 = vector.extract_strided_slice %11 {offsets = [0, 0], sizes = [8, 128], strides = [1, 1]} : vector<64x128xf32> to vector<8x128xf32>
    %16 = arith.addf %15, %13 : vector<8x128xf32>
    %17 = arith.negf %16 : vector<8x128xf32>
    %18 = math.exp %17 : vector<8x128xf32>
    %cst_14 = arith.constant 1.000000e+00 : f32
    %19 = vector.broadcast %cst_14 : f32 to vector<8x128xf32>
    %20 = arith.addf %19, %18 : vector<8x128xf32>
    %21 = arith.divf %19, %20 : vector<8x128xf32>
    %22 = math.tanh %16 : vector<8x128xf32>
    %23 = vector.extract_strided_slice %21 {offsets = [0, 32], sizes = [8, 32], strides = [1, 1]} : vector<8x128xf32> to vector<8x32xf32>
    %24 = arith.mulf %23, %12 : vector<8x32xf32>
    %25 = vector.extract_strided_slice %21 {offsets = [0, 0], sizes = [8, 32], strides = [1, 1]} : vector<8x128xf32> to vector<8x32xf32>
    %26 = vector.extract_strided_slice %22 {offsets = [0, 64], sizes = [8, 32], strides = [1, 1]} : vector<8x128xf32> to vector<8x32xf32>
    %27 = arith.mulf %25, %26 : vector<8x32xf32>
    %28 = arith.addf %24, %27 : vector<8x32xf32>
    %29 = vector.extract_strided_slice %21 {offsets = [0, 96], sizes = [8, 32], strides = [1, 1]} : vector<8x128xf32> to vector<8x32xf32>
    %30 = math.tanh %28 : vector<8x32xf32>
    %31 = arith.mulf %29, %30 : vector<8x32xf32>
    %32 = arith.truncf %31 : vector<8x32xf32> to vector<8x32xbf16>
    %cst_15 = arith.constant dense<0.000000e+00> : vector<8x256xf32>
    %33 = tpu.matmul %32, %0, %cst_15 {dimension_numbers = #tpu.dot_dimension_numbers<[1], [0], [0], [1], [0, 0, 1, 1], [], []>} : vector<8x32xbf16>, vector<32x256xbf16>, vector<8x256xf32> -> vector<8x256xf32>
    %cst_16 = arith.constant dense<0.000000e+00> : vector<8x128xf32>
    %34 = tpu.matmul %14, %1, %cst_16 {dimension_numbers = #tpu.dot_dimension_numbers<[1], [0], [0], [1], [0, 0, 1, 1], [], []>} : vector<8x32xbf16>, vector<32x128xbf16>, vector<8x128xf32> -> vector<8x128xf32>
    %35 = vector.extract_strided_slice %33 {offsets = [0, 128], sizes = [8, 128], strides = [1, 1]} : vector<8x256xf32> to vector<8x128xf32>
    %36 = vector.extract_strided_slice %33 {offsets = [0, 0], sizes = [8, 128], strides = [1, 1]} : vector<8x256xf32> to vector<8x128xf32>
    %37 = arith.addf %36, %34 : vector<8x128xf32>
    %38 = arith.addf %37, %4 : vector<8x128xf32>
    %39 = arith.negf %38 : vector<8x128xf32>
    %40 = math.exp %39 : vector<8x128xf32>
    %cst_17 = arith.constant 1.000000e+00 : f32
    %41 = vector.broadcast %cst_17 : f32 to vector<8x128xf32>
    %42 = arith.addf %41, %40 : vector<8x128xf32>
    %43 = arith.divf %41, %42 : vector<8x128xf32>
    %44 = math.tanh %38 : vector<8x128xf32>
    %45 = vector.extract_strided_slice %43 {offsets = [0, 32], sizes = [8, 32], strides = [1, 1]} : vector<8x128xf32> to vector<8x32xf32>
    %46 = arith.mulf %45, %12 : vector<8x32xf32>
    %47 = vector.extract_strided_slice %43 {offsets = [0, 0], sizes = [8, 32], strides = [1, 1]} : vector<8x128xf32> to vector<8x32xf32>
    %48 = vector.extract_strided_slice %44 {offsets = [0, 64], sizes = [8, 32], strides = [1, 1]} : vector<8x128xf32> to vector<8x32xf32>
    %49 = arith.mulf %47, %48 : vector<8x32xf32>
    %50 = arith.addf %46, %49 : vector<8x32xf32>
    %51 = vector.extract_strided_slice %43 {offsets = [0, 96], sizes = [8, 32], strides = [1, 1]} : vector<8x128xf32> to vector<8x32xf32>
    %52 = math.tanh %50 : vector<8x32xf32>
    %53 = arith.mulf %51, %52 : vector<8x32xf32>
    %54 = arith.truncf %53 : vector<8x32xf32> to vector<8x32xbf16>
    %55 = vector.extract_strided_slice %11 {offsets = [8, 0], sizes = [8, 128], strides = [1, 1]} : vector<64x128xf32> to vector<8x128xf32>
    %56 = arith.addf %55, %35 : vector<8x128xf32>
    %57 = arith.negf %56 : vector<8x128xf32>
    %58 = math.exp %57 : vector<8x128xf32>
    %cst_18 = arith.constant 1.000000e+00 : f32
    %59 = vector.broadcast %cst_18 : f32 to vector<8x128xf32>
    %60 = arith.addf %59, %58 : vector<8x128xf32>
    %61 = arith.divf %59, %60 : vector<8x128xf32>
    %62 = math.tanh %56 : vector<8x128xf32>
    %63 = vector.extract_strided_slice %61 {offsets = [0, 32], sizes = [8, 32], strides = [1, 1]} : vector<8x128xf32> to vector<8x32xf32>
    %64 = arith.mulf %63, %28 : vector<8x32xf32>
    %65 = vector.extract_strided_slice %61 {offsets = [0, 0], sizes = [8, 32], strides = [1, 1]} : vector<8x128xf32> to vector<8x32xf32>
    %66 = vector.extract_strided_slice %62 {offsets = [0, 64], sizes = [8, 32], strides = [1, 1]} : vector<8x128xf32> to vector<8x32xf32>
    %67 = arith.mulf %65, %66 : vector<8x32xf32>
    %68 = arith.addf %64, %67 : vector<8x32xf32>
    %69 = vector.extract_strided_slice %61 {offsets = [0, 96], sizes = [8, 32], strides = [1, 1]} : vector<8x128xf32> to vector<8x32xf32>
    %70 = math.tanh %68 : vector<8x32xf32>
    %71 = arith.mulf %69, %70 : vector<8x32xf32>
    %72 = arith.truncf %71 : vector<8x32xf32> to vector<8x32xbf16>
    %cst_19 = arith.constant dense<0.000000e+00> : vector<8x256xf32>
    %73 = tpu.matmul %72, %0, %cst_19 {dimension_numbers = #tpu.dot_dimension_numbers<[1], [0], [0], [1], [0, 0, 1, 1], [], []>} : vector<8x32xbf16>, vector<32x256xbf16>, vector<8x256xf32> -> vector<8x256xf32>
    %cst_20 = arith.constant dense<0.000000e+00> : vector<8x128xf32>
    %74 = tpu.matmul %54, %1, %cst_20 {dimension_numbers = #tpu.dot_dimension_numbers<[1], [0], [0], [1], [0, 0, 1, 1], [], []>} : vector<8x32xbf16>, vector<32x128xbf16>, vector<8x128xf32> -> vector<8x128xf32>
    %75 = vector.extract_strided_slice %73 {offsets = [0, 128], sizes = [8, 128], strides = [1, 1]} : vector<8x256xf32> to vector<8x128xf32>
    %76 = vector.extract_strided_slice %73 {offsets = [0, 0], sizes = [8, 128], strides = [1, 1]} : vector<8x256xf32> to vector<8x128xf32>
    %77 = arith.addf %76, %74 : vector<8x128xf32>
    %78 = arith.addf %77, %4 : vector<8x128xf32>
    %79 = arith.negf %78 : vector<8x128xf32>
    %80 = math.exp %79 : vector<8x128xf32>
    %cst_21 = arith.constant 1.000000e+00 : f32
    %81 = vector.broadcast %cst_21 : f32 to vector<8x128xf32>
    %82 = arith.addf %81, %80 : vector<8x128xf32>
    %83 = arith.divf %81, %82 : vector<8x128xf32>
    %84 = math.tanh %78 : vector<8x128xf32>
    %85 = vector.extract_strided_slice %83 {offsets = [0, 32], sizes = [8, 32], strides = [1, 1]} : vector<8x128xf32> to vector<8x32xf32>
    %86 = arith.mulf %85, %50 : vector<8x32xf32>
    %87 = vector.extract_strided_slice %83 {offsets = [0, 0], sizes = [8, 32], strides = [1, 1]} : vector<8x128xf32> to vector<8x32xf32>
    %88 = vector.extract_strided_slice %84 {offsets = [0, 64], sizes = [8, 32], strides = [1, 1]} : vector<8x128xf32> to vector<8x32xf32>
    %89 = arith.mulf %87, %88 : vector<8x32xf32>
    %90 = arith.addf %86, %89 : vector<8x32xf32>
    %91 = vector.extract_strided_slice %83 {offsets = [0, 96], sizes = [8, 32], strides = [1, 1]} : vector<8x128xf32> to vector<8x32xf32>
    %92 = math.tanh %90 : vector<8x32xf32>
    %93 = arith.mulf %91, %92 : vector<8x32xf32>
    %94 = arith.truncf %93 : vector<8x32xf32> to vector<8x32xbf16>
    %95 = vector.extract_strided_slice %11 {offsets = [16, 0], sizes = [8, 128], strides = [1, 1]} : vector<64x128xf32> to vector<8x128xf32>
    %96 = arith.addf %95, %75 : vector<8x128xf32>
    %97 = arith.negf %96 : vector<8x128xf32>
    %98 = math.exp %97 : vector<8x128xf32>
    %cst_22 = arith.constant 1.000000e+00 : f32
    %99 = vector.broadcast %cst_22 : f32 to vector<8x128xf32>
    %100 = arith.addf %99, %98 : vector<8x128xf32>
    %101 = arith.divf %99, %100 : vector<8x128xf32>
    %102 = math.tanh %96 : vector<8x128xf32>
    %103 = vector.extract_strided_slice %101 {offsets = [0, 32], sizes = [8, 32], strides = [1, 1]} : vector<8x128xf32> to vector<8x32xf32>
    %104 = arith.mulf %103, %68 : vector<8x32xf32>
    %105 = vector.extract_strided_slice %101 {offsets = [0, 0], sizes = [8, 32], strides = [1, 1]} : vector<8x128xf32> to vector<8x32xf32>
    %106 = vector.extract_strided_slice %102 {offsets = [0, 64], sizes = [8, 32], strides = [1, 1]} : vector<8x128xf32> to vector<8x32xf32>
    %107 = arith.mulf %105, %106 : vector<8x32xf32>
    %108 = arith.addf %104, %107 : vector<8x32xf32>
    %109 = vector.extract_strided_slice %101 {offsets = [0, 96], sizes = [8, 32], strides = [1, 1]} : vector<8x128xf32> to vector<8x32xf32>
    %110 = math.tanh %108 : vector<8x32xf32>
    %111 = arith.mulf %109, %110 : vector<8x32xf32>
    %112 = arith.truncf %111 : vector<8x32xf32> to vector<8x32xbf16>
    %cst_23 = arith.constant dense<0.000000e+00> : vector<8x256xf32>
    %113 = tpu.matmul %112, %0, %cst_23 {dimension_numbers = #tpu.dot_dimension_numbers<[1], [0], [0], [1], [0, 0, 1, 1], [], []>} : vector<8x32xbf16>, vector<32x256xbf16>, vector<8x256xf32> -> vector<8x256xf32>
    %cst_24 = arith.constant dense<0.000000e+00> : vector<8x128xf32>
    %114 = tpu.matmul %94, %1, %cst_24 {dimension_numbers = #tpu.dot_dimension_numbers<[1], [0], [0], [1], [0, 0, 1, 1], [], []>} : vector<8x32xbf16>, vector<32x128xbf16>, vector<8x128xf32> -> vector<8x128xf32>
    %115 = vector.extract_strided_slice %113 {offsets = [0, 128], sizes = [8, 128], strides = [1, 1]} : vector<8x256xf32> to vector<8x128xf32>
    %116 = vector.extract_strided_slice %113 {offsets = [0, 0], sizes = [8, 128], strides = [1, 1]} : vector<8x256xf32> to vector<8x128xf32>
    %117 = arith.addf %116, %114 : vector<8x128xf32>
    %118 = arith.addf %117, %4 : vector<8x128xf32>
    %119 = arith.negf %118 : vector<8x128xf32>
    %120 = math.exp %119 : vector<8x128xf32>
    %cst_25 = arith.constant 1.000000e+00 : f32
    %121 = vector.broadcast %cst_25 : f32 to vector<8x128xf32>
    %122 = arith.addf %121, %120 : vector<8x128xf32>
    %123 = arith.divf %121, %122 : vector<8x128xf32>
    %124 = math.tanh %118 : vector<8x128xf32>
    %125 = vector.extract_strided_slice %123 {offsets = [0, 32], sizes = [8, 32], strides = [1, 1]} : vector<8x128xf32> to vector<8x32xf32>
    %126 = arith.mulf %125, %90 : vector<8x32xf32>
    %127 = vector.extract_strided_slice %123 {offsets = [0, 0], sizes = [8, 32], strides = [1, 1]} : vector<8x128xf32> to vector<8x32xf32>
    %128 = vector.extract_strided_slice %124 {offsets = [0, 64], sizes = [8, 32], strides = [1, 1]} : vector<8x128xf32> to vector<8x32xf32>
    %129 = arith.mulf %127, %128 : vector<8x32xf32>
    %130 = arith.addf %126, %129 : vector<8x32xf32>
    %131 = vector.extract_strided_slice %123 {offsets = [0, 96], sizes = [8, 32], strides = [1, 1]} : vector<8x128xf32> to vector<8x32xf32>
    %132 = math.tanh %130 : vector<8x32xf32>
    %133 = arith.mulf %131, %132 : vector<8x32xf32>
    %134 = arith.truncf %133 : vector<8x32xf32> to vector<8x32xbf16>
    %135 = vector.extract_strided_slice %11 {offsets = [24, 0], sizes = [8, 128], strides = [1, 1]} : vector<64x128xf32> to vector<8x128xf32>
    %136 = arith.addf %135, %115 : vector<8x128xf32>
    %137 = arith.negf %136 : vector<8x128xf32>
    %138 = math.exp %137 : vector<8x128xf32>
    %cst_26 = arith.constant 1.000000e+00 : f32
    %139 = vector.broadcast %cst_26 : f32 to vector<8x128xf32>
    %140 = arith.addf %139, %138 : vector<8x128xf32>
    %141 = arith.divf %139, %140 : vector<8x128xf32>
    %142 = math.tanh %136 : vector<8x128xf32>
    %143 = vector.extract_strided_slice %141 {offsets = [0, 32], sizes = [8, 32], strides = [1, 1]} : vector<8x128xf32> to vector<8x32xf32>
    %144 = arith.mulf %143, %108 : vector<8x32xf32>
    %145 = vector.extract_strided_slice %141 {offsets = [0, 0], sizes = [8, 32], strides = [1, 1]} : vector<8x128xf32> to vector<8x32xf32>
    %146 = vector.extract_strided_slice %142 {offsets = [0, 64], sizes = [8, 32], strides = [1, 1]} : vector<8x128xf32> to vector<8x32xf32>
    %147 = arith.mulf %145, %146 : vector<8x32xf32>
    %148 = arith.addf %144, %147 : vector<8x32xf32>
    %149 = vector.extract_strided_slice %141 {offsets = [0, 96], sizes = [8, 32], strides = [1, 1]} : vector<8x128xf32> to vector<8x32xf32>
    %150 = math.tanh %148 : vector<8x32xf32>
    %151 = arith.mulf %149, %150 : vector<8x32xf32>
    %152 = arith.truncf %151 : vector<8x32xf32> to vector<8x32xbf16>
    %cst_27 = arith.constant dense<0.000000e+00> : vector<8x256xf32>
    %153 = tpu.matmul %152, %0, %cst_27 {dimension_numbers = #tpu.dot_dimension_numbers<[1], [0], [0], [1], [0, 0, 1, 1], [], []>} : vector<8x32xbf16>, vector<32x256xbf16>, vector<8x256xf32> -> vector<8x256xf32>
    %cst_28 = arith.constant dense<0.000000e+00> : vector<8x128xf32>
    %154 = tpu.matmul %134, %1, %cst_28 {dimension_numbers = #tpu.dot_dimension_numbers<[1], [0], [0], [1], [0, 0, 1, 1], [], []>} : vector<8x32xbf16>, vector<32x128xbf16>, vector<8x128xf32> -> vector<8x128xf32>
    %155 = vector.extract_strided_slice %153 {offsets = [0, 128], sizes = [8, 128], strides = [1, 1]} : vector<8x256xf32> to vector<8x128xf32>
    %156 = vector.extract_strided_slice %153 {offsets = [0, 0], sizes = [8, 128], strides = [1, 1]} : vector<8x256xf32> to vector<8x128xf32>
    %157 = arith.addf %156, %154 : vector<8x128xf32>
    %158 = arith.addf %157, %4 : vector<8x128xf32>
    %159 = arith.negf %158 : vector<8x128xf32>
    %160 = math.exp %159 : vector<8x128xf32>
    %cst_29 = arith.constant 1.000000e+00 : f32
    %161 = vector.broadcast %cst_29 : f32 to vector<8x128xf32>
    %162 = arith.addf %161, %160 : vector<8x128xf32>
    %163 = arith.divf %161, %162 : vector<8x128xf32>
    %164 = math.tanh %158 : vector<8x128xf32>
    %165 = vector.extract_strided_slice %163 {offsets = [0, 32], sizes = [8, 32], strides = [1, 1]} : vector<8x128xf32> to vector<8x32xf32>
    %166 = arith.mulf %165, %130 : vector<8x32xf32>
    %167 = vector.extract_strided_slice %163 {offsets = [0, 0], sizes = [8, 32], strides = [1, 1]} : vector<8x128xf32> to vector<8x32xf32>
    %168 = vector.extract_strided_slice %164 {offsets = [0, 64], sizes = [8, 32], strides = [1, 1]} : vector<8x128xf32> to vector<8x32xf32>
    %169 = arith.mulf %167, %168 : vector<8x32xf32>
    %170 = arith.addf %166, %169 : vector<8x32xf32>
    %171 = vector.extract_strided_slice %163 {offsets = [0, 96], sizes = [8, 32], strides = [1, 1]} : vector<8x128xf32> to vector<8x32xf32>
    %172 = math.tanh %170 : vector<8x32xf32>
    %173 = arith.mulf %171, %172 : vector<8x32xf32>
    %174 = arith.truncf %173 : vector<8x32xf32> to vector<8x32xbf16>
    %175 = vector.extract_strided_slice %11 {offsets = [32, 0], sizes = [8, 128], strides = [1, 1]} : vector<64x128xf32> to vector<8x128xf32>
    %176 = arith.addf %175, %155 : vector<8x128xf32>
    %177 = arith.negf %176 : vector<8x128xf32>
    %178 = math.exp %177 : vector<8x128xf32>
    %cst_30 = arith.constant 1.000000e+00 : f32
    %179 = vector.broadcast %cst_30 : f32 to vector<8x128xf32>
    %180 = arith.addf %179, %178 : vector<8x128xf32>
    %181 = arith.divf %179, %180 : vector<8x128xf32>
    %182 = math.tanh %176 : vector<8x128xf32>
    %183 = vector.extract_strided_slice %181 {offsets = [0, 32], sizes = [8, 32], strides = [1, 1]} : vector<8x128xf32> to vector<8x32xf32>
    %184 = arith.mulf %183, %148 : vector<8x32xf32>
    %185 = vector.extract_strided_slice %181 {offsets = [0, 0], sizes = [8, 32], strides = [1, 1]} : vector<8x128xf32> to vector<8x32xf32>
    %186 = vector.extract_strided_slice %182 {offsets = [0, 64], sizes = [8, 32], strides = [1, 1]} : vector<8x128xf32> to vector<8x32xf32>
    %187 = arith.mulf %185, %186 : vector<8x32xf32>
    %188 = arith.addf %184, %187 : vector<8x32xf32>
    %189 = vector.extract_strided_slice %181 {offsets = [0, 96], sizes = [8, 32], strides = [1, 1]} : vector<8x128xf32> to vector<8x32xf32>
    %190 = math.tanh %188 : vector<8x32xf32>
    %191 = arith.mulf %189, %190 : vector<8x32xf32>
    %192 = arith.truncf %191 : vector<8x32xf32> to vector<8x32xbf16>
    %cst_31 = arith.constant dense<0.000000e+00> : vector<8x256xf32>
    %193 = tpu.matmul %192, %0, %cst_31 {dimension_numbers = #tpu.dot_dimension_numbers<[1], [0], [0], [1], [0, 0, 1, 1], [], []>} : vector<8x32xbf16>, vector<32x256xbf16>, vector<8x256xf32> -> vector<8x256xf32>
    %cst_32 = arith.constant dense<0.000000e+00> : vector<8x128xf32>
    %194 = tpu.matmul %174, %1, %cst_32 {dimension_numbers = #tpu.dot_dimension_numbers<[1], [0], [0], [1], [0, 0, 1, 1], [], []>} : vector<8x32xbf16>, vector<32x128xbf16>, vector<8x128xf32> -> vector<8x128xf32>
    %195 = vector.extract_strided_slice %193 {offsets = [0, 128], sizes = [8, 128], strides = [1, 1]} : vector<8x256xf32> to vector<8x128xf32>
    %196 = vector.extract_strided_slice %193 {offsets = [0, 0], sizes = [8, 128], strides = [1, 1]} : vector<8x256xf32> to vector<8x128xf32>
    %197 = arith.addf %196, %194 : vector<8x128xf32>
    %198 = arith.addf %197, %4 : vector<8x128xf32>
    %199 = arith.negf %198 : vector<8x128xf32>
    %200 = math.exp %199 : vector<8x128xf32>
    %cst_33 = arith.constant 1.000000e+00 : f32
    %201 = vector.broadcast %cst_33 : f32 to vector<8x128xf32>
    %202 = arith.addf %201, %200 : vector<8x128xf32>
    %203 = arith.divf %201, %202 : vector<8x128xf32>
    %204 = math.tanh %198 : vector<8x128xf32>
    %205 = vector.extract_strided_slice %203 {offsets = [0, 32], sizes = [8, 32], strides = [1, 1]} : vector<8x128xf32> to vector<8x32xf32>
    %206 = arith.mulf %205, %170 : vector<8x32xf32>
    %207 = vector.extract_strided_slice %203 {offsets = [0, 0], sizes = [8, 32], strides = [1, 1]} : vector<8x128xf32> to vector<8x32xf32>
    %208 = vector.extract_strided_slice %204 {offsets = [0, 64], sizes = [8, 32], strides = [1, 1]} : vector<8x128xf32> to vector<8x32xf32>
    %209 = arith.mulf %207, %208 : vector<8x32xf32>
    %210 = arith.addf %206, %209 : vector<8x32xf32>
    %211 = vector.extract_strided_slice %203 {offsets = [0, 96], sizes = [8, 32], strides = [1, 1]} : vector<8x128xf32> to vector<8x32xf32>
    %212 = math.tanh %210 : vector<8x32xf32>
    %213 = arith.mulf %211, %212 : vector<8x32xf32>
    %214 = arith.truncf %213 : vector<8x32xf32> to vector<8x32xbf16>
    %215 = vector.extract_strided_slice %11 {offsets = [40, 0], sizes = [8, 128], strides = [1, 1]} : vector<64x128xf32> to vector<8x128xf32>
    %216 = arith.addf %215, %195 : vector<8x128xf32>
    %217 = arith.negf %216 : vector<8x128xf32>
    %218 = math.exp %217 : vector<8x128xf32>
    %cst_34 = arith.constant 1.000000e+00 : f32
    %219 = vector.broadcast %cst_34 : f32 to vector<8x128xf32>
    %220 = arith.addf %219, %218 : vector<8x128xf32>
    %221 = arith.divf %219, %220 : vector<8x128xf32>
    %222 = math.tanh %216 : vector<8x128xf32>
    %223 = vector.extract_strided_slice %221 {offsets = [0, 32], sizes = [8, 32], strides = [1, 1]} : vector<8x128xf32> to vector<8x32xf32>
    %224 = arith.mulf %223, %188 : vector<8x32xf32>
    %225 = vector.extract_strided_slice %221 {offsets = [0, 0], sizes = [8, 32], strides = [1, 1]} : vector<8x128xf32> to vector<8x32xf32>
    %226 = vector.extract_strided_slice %222 {offsets = [0, 64], sizes = [8, 32], strides = [1, 1]} : vector<8x128xf32> to vector<8x32xf32>
    %227 = arith.mulf %225, %226 : vector<8x32xf32>
    %228 = arith.addf %224, %227 : vector<8x32xf32>
    %229 = vector.extract_strided_slice %221 {offsets = [0, 96], sizes = [8, 32], strides = [1, 1]} : vector<8x128xf32> to vector<8x32xf32>
    %230 = math.tanh %228 : vector<8x32xf32>
    %231 = arith.mulf %229, %230 : vector<8x32xf32>
    %232 = arith.truncf %231 : vector<8x32xf32> to vector<8x32xbf16>
    %cst_35 = arith.constant dense<0.000000e+00> : vector<8x256xf32>
    %233 = tpu.matmul %232, %0, %cst_35 {dimension_numbers = #tpu.dot_dimension_numbers<[1], [0], [0], [1], [0, 0, 1, 1], [], []>} : vector<8x32xbf16>, vector<32x256xbf16>, vector<8x256xf32> -> vector<8x256xf32>
    %cst_36 = arith.constant dense<0.000000e+00> : vector<8x128xf32>
    %234 = tpu.matmul %214, %1, %cst_36 {dimension_numbers = #tpu.dot_dimension_numbers<[1], [0], [0], [1], [0, 0, 1, 1], [], []>} : vector<8x32xbf16>, vector<32x128xbf16>, vector<8x128xf32> -> vector<8x128xf32>
    %235 = vector.extract_strided_slice %233 {offsets = [0, 128], sizes = [8, 128], strides = [1, 1]} : vector<8x256xf32> to vector<8x128xf32>
    %236 = vector.extract_strided_slice %233 {offsets = [0, 0], sizes = [8, 128], strides = [1, 1]} : vector<8x256xf32> to vector<8x128xf32>
    %237 = arith.addf %236, %234 : vector<8x128xf32>
    %238 = arith.addf %237, %4 : vector<8x128xf32>
    %239 = arith.negf %238 : vector<8x128xf32>
    %240 = math.exp %239 : vector<8x128xf32>
    %cst_37 = arith.constant 1.000000e+00 : f32
    %241 = vector.broadcast %cst_37 : f32 to vector<8x128xf32>
    %242 = arith.addf %241, %240 : vector<8x128xf32>
    %243 = arith.divf %241, %242 : vector<8x128xf32>
    %244 = math.tanh %238 : vector<8x128xf32>
    %245 = vector.extract_strided_slice %243 {offsets = [0, 32], sizes = [8, 32], strides = [1, 1]} : vector<8x128xf32> to vector<8x32xf32>
    %246 = arith.mulf %245, %210 : vector<8x32xf32>
    %247 = vector.extract_strided_slice %243 {offsets = [0, 0], sizes = [8, 32], strides = [1, 1]} : vector<8x128xf32> to vector<8x32xf32>
    %248 = vector.extract_strided_slice %244 {offsets = [0, 64], sizes = [8, 32], strides = [1, 1]} : vector<8x128xf32> to vector<8x32xf32>
    %249 = arith.mulf %247, %248 : vector<8x32xf32>
    %250 = arith.addf %246, %249 : vector<8x32xf32>
    %251 = vector.extract_strided_slice %243 {offsets = [0, 96], sizes = [8, 32], strides = [1, 1]} : vector<8x128xf32> to vector<8x32xf32>
    %252 = math.tanh %250 : vector<8x32xf32>
    %253 = arith.mulf %251, %252 : vector<8x32xf32>
    %254 = arith.truncf %253 : vector<8x32xf32> to vector<8x32xbf16>
    %255 = vector.extract_strided_slice %11 {offsets = [48, 0], sizes = [8, 128], strides = [1, 1]} : vector<64x128xf32> to vector<8x128xf32>
    %256 = arith.addf %255, %235 : vector<8x128xf32>
    %257 = arith.negf %256 : vector<8x128xf32>
    %258 = math.exp %257 : vector<8x128xf32>
    %cst_38 = arith.constant 1.000000e+00 : f32
    %259 = vector.broadcast %cst_38 : f32 to vector<8x128xf32>
    %260 = arith.addf %259, %258 : vector<8x128xf32>
    %261 = arith.divf %259, %260 : vector<8x128xf32>
    %262 = math.tanh %256 : vector<8x128xf32>
    %263 = vector.extract_strided_slice %261 {offsets = [0, 32], sizes = [8, 32], strides = [1, 1]} : vector<8x128xf32> to vector<8x32xf32>
    %264 = arith.mulf %263, %228 : vector<8x32xf32>
    %265 = vector.extract_strided_slice %261 {offsets = [0, 0], sizes = [8, 32], strides = [1, 1]} : vector<8x128xf32> to vector<8x32xf32>
    %266 = vector.extract_strided_slice %262 {offsets = [0, 64], sizes = [8, 32], strides = [1, 1]} : vector<8x128xf32> to vector<8x32xf32>
    %267 = arith.mulf %265, %266 : vector<8x32xf32>
    %268 = arith.addf %264, %267 : vector<8x32xf32>
    %269 = vector.extract_strided_slice %261 {offsets = [0, 96], sizes = [8, 32], strides = [1, 1]} : vector<8x128xf32> to vector<8x32xf32>
    %270 = math.tanh %268 : vector<8x32xf32>
    %271 = arith.mulf %269, %270 : vector<8x32xf32>
    %272 = arith.truncf %271 : vector<8x32xf32> to vector<8x32xbf16>
    %cst_39 = arith.constant dense<0.000000e+00> : vector<8x256xf32>
    %273 = tpu.matmul %272, %0, %cst_39 {dimension_numbers = #tpu.dot_dimension_numbers<[1], [0], [0], [1], [0, 0, 1, 1], [], []>} : vector<8x32xbf16>, vector<32x256xbf16>, vector<8x256xf32> -> vector<8x256xf32>
    %cst_40 = arith.constant dense<0.000000e+00> : vector<8x128xf32>
    %274 = tpu.matmul %254, %1, %cst_40 {dimension_numbers = #tpu.dot_dimension_numbers<[1], [0], [0], [1], [0, 0, 1, 1], [], []>} : vector<8x32xbf16>, vector<32x128xbf16>, vector<8x128xf32> -> vector<8x128xf32>
    %275 = vector.extract_strided_slice %273 {offsets = [0, 128], sizes = [8, 128], strides = [1, 1]} : vector<8x256xf32> to vector<8x128xf32>
    %276 = vector.extract_strided_slice %273 {offsets = [0, 0], sizes = [8, 128], strides = [1, 1]} : vector<8x256xf32> to vector<8x128xf32>
    %277 = arith.addf %276, %274 : vector<8x128xf32>
    %278 = arith.addf %277, %4 : vector<8x128xf32>
    %279 = arith.negf %278 : vector<8x128xf32>
    %280 = math.exp %279 : vector<8x128xf32>
    %cst_41 = arith.constant 1.000000e+00 : f32
    %281 = vector.broadcast %cst_41 : f32 to vector<8x128xf32>
    %282 = arith.addf %281, %280 : vector<8x128xf32>
    %283 = arith.divf %281, %282 : vector<8x128xf32>
    %284 = math.tanh %278 : vector<8x128xf32>
    %285 = vector.extract_strided_slice %283 {offsets = [0, 32], sizes = [8, 32], strides = [1, 1]} : vector<8x128xf32> to vector<8x32xf32>
    %286 = arith.mulf %285, %250 : vector<8x32xf32>
    %287 = vector.extract_strided_slice %283 {offsets = [0, 0], sizes = [8, 32], strides = [1, 1]} : vector<8x128xf32> to vector<8x32xf32>
    %288 = vector.extract_strided_slice %284 {offsets = [0, 64], sizes = [8, 32], strides = [1, 1]} : vector<8x128xf32> to vector<8x32xf32>
    %289 = arith.mulf %287, %288 : vector<8x32xf32>
    %290 = arith.addf %286, %289 : vector<8x32xf32>
    %291 = vector.extract_strided_slice %283 {offsets = [0, 96], sizes = [8, 32], strides = [1, 1]} : vector<8x128xf32> to vector<8x32xf32>
    %292 = math.tanh %290 : vector<8x32xf32>
    %293 = arith.mulf %291, %292 : vector<8x32xf32>
    %294 = arith.truncf %293 : vector<8x32xf32> to vector<8x32xbf16>
    %295 = vector.extract_strided_slice %11 {offsets = [56, 0], sizes = [8, 128], strides = [1, 1]} : vector<64x128xf32> to vector<8x128xf32>
    %296 = arith.addf %295, %275 : vector<8x128xf32>
    %297 = arith.negf %296 : vector<8x128xf32>
    %298 = math.exp %297 : vector<8x128xf32>
    %cst_42 = arith.constant 1.000000e+00 : f32
    %299 = vector.broadcast %cst_42 : f32 to vector<8x128xf32>
    %300 = arith.addf %299, %298 : vector<8x128xf32>
    %301 = arith.divf %299, %300 : vector<8x128xf32>
    %302 = math.tanh %296 : vector<8x128xf32>
    %303 = vector.extract_strided_slice %301 {offsets = [0, 32], sizes = [8, 32], strides = [1, 1]} : vector<8x128xf32> to vector<8x32xf32>
    %304 = arith.mulf %303, %268 : vector<8x32xf32>
    %305 = vector.extract_strided_slice %301 {offsets = [0, 0], sizes = [8, 32], strides = [1, 1]} : vector<8x128xf32> to vector<8x32xf32>
    %306 = vector.extract_strided_slice %302 {offsets = [0, 64], sizes = [8, 32], strides = [1, 1]} : vector<8x128xf32> to vector<8x32xf32>
    %307 = arith.mulf %305, %306 : vector<8x32xf32>
    %308 = arith.addf %304, %307 : vector<8x32xf32>
    %309 = vector.extract_strided_slice %301 {offsets = [0, 96], sizes = [8, 32], strides = [1, 1]} : vector<8x128xf32> to vector<8x32xf32>
    %310 = math.tanh %308 : vector<8x32xf32>
    %311 = arith.mulf %309, %310 : vector<8x32xf32>
    %312 = arith.truncf %311 : vector<8x32xf32> to vector<8x32xbf16>
    %cst_43 = arith.constant dense<0.000000e+00> : vector<8x256xf32>
    %313 = tpu.matmul %312, %0, %cst_43 {dimension_numbers = #tpu.dot_dimension_numbers<[1], [0], [0], [1], [0, 0, 1, 1], [], []>} : vector<8x32xbf16>, vector<32x256xbf16>, vector<8x256xf32> -> vector<8x256xf32>
    %cst_44 = arith.constant dense<0.000000e+00> : vector<8x128xf32>
    %314 = tpu.matmul %294, %1, %cst_44 {dimension_numbers = #tpu.dot_dimension_numbers<[1], [0], [0], [1], [0, 0, 1, 1], [], []>} : vector<8x32xbf16>, vector<32x128xbf16>, vector<8x128xf32> -> vector<8x128xf32>
    %315 = vector.extract_strided_slice %313 {offsets = [0, 0], sizes = [8, 128], strides = [1, 1]} : vector<8x256xf32> to vector<8x128xf32>
    %316 = arith.addf %315, %314 : vector<8x128xf32>
    %317 = arith.addf %316, %4 : vector<8x128xf32>
    %318 = arith.negf %317 : vector<8x128xf32>
    %319 = math.exp %318 : vector<8x128xf32>
    %cst_45 = arith.constant 1.000000e+00 : f32
    %320 = vector.broadcast %cst_45 : f32 to vector<8x128xf32>
    %321 = arith.addf %320, %319 : vector<8x128xf32>
    %322 = arith.divf %320, %321 : vector<8x128xf32>
    %323 = math.tanh %317 : vector<8x128xf32>
    %324 = vector.extract_strided_slice %322 {offsets = [0, 32], sizes = [8, 32], strides = [1, 1]} : vector<8x128xf32> to vector<8x32xf32>
    %325 = arith.mulf %324, %290 : vector<8x32xf32>
    %326 = vector.extract_strided_slice %322 {offsets = [0, 0], sizes = [8, 32], strides = [1, 1]} : vector<8x128xf32> to vector<8x32xf32>
    %327 = vector.extract_strided_slice %323 {offsets = [0, 64], sizes = [8, 32], strides = [1, 1]} : vector<8x128xf32> to vector<8x32xf32>
    %328 = arith.mulf %326, %327 : vector<8x32xf32>
    %329 = arith.addf %325, %328 : vector<8x32xf32>
    %330 = vector.extract_strided_slice %322 {offsets = [0, 96], sizes = [8, 32], strides = [1, 1]} : vector<8x128xf32> to vector<8x32xf32>
    %331 = math.tanh %329 : vector<8x32xf32>
    %332 = arith.mulf %330, %331 : vector<8x32xf32>
    %333 = tpu.concatenate %53, %93, %133, %173, %213, %253, %293, %332 in 0 : vector<8x32xf32>, vector<8x32xf32>, vector<8x32xf32>, vector<8x32xf32>, vector<8x32xf32>, vector<8x32xf32>, vector<8x32xf32>, vector<8x32xf32> -> vector<64x32xf32>
    %334 = arith.truncf %333 : vector<64x32xf32> to vector<64x32xbf16>
    %c0_46 = arith.constant 0 : index
    %c0_47 = arith.constant 0 : index
    %335 = vector.load %arg6[%c0_46, %c0_47] : memref<32x128xbf16, #tpu.memory_space<vmem>>, vector<32x128xbf16>
    %cst_48 = arith.constant dense<0.000000e+00> : vector<64x128xf32>
    %336 = tpu.matmul %334, %335, %cst_48 {dimension_numbers = #tpu.dot_dimension_numbers<[1], [0], [0], [1], [0, 0, 1, 1], [], []>} : vector<64x32xbf16>, vector<32x128xbf16>, vector<64x128xf32> -> vector<64x128xf32>
    %c0_49 = arith.constant 0 : index
    %c0_50 = arith.constant 0 : index
    %337 = vector.load %arg7[%c0_49, %c0_50] : memref<1x128xf32, #tpu.memory_space<vmem>>, vector<1x128xf32>
    %338 = vector.shape_cast %337 : vector<1x128xf32> to vector<1x128xf32>
    %339 = vector.broadcast %338 : vector<1x128xf32> to vector<64x128xf32>
    %340 = arith.addf %336, %339 : vector<64x128xf32>
    %c0_51 = arith.constant 0 : index
    %c0_52 = arith.constant 0 : index
    %341 = vector.load %arg8[%c0_51, %c0_52] : memref<64x128xf32, #tpu.memory_space<vmem>>, vector<64x128xf32>
    tpu.vector_store %arg8[%c0_51, %c0_52], %340 {strides = array<i32>} : memref<64x128xf32, #tpu.memory_space<vmem>>, vector<64x128xf32>,
    return
  }
}

</mosaic_0001>

<bundles_post_ra>
// kernel: tpu_custom_call.1
= control target key start
LH: loop header
LB: loop body
LE: loop exit
PB: predicated region body
PF: predicated region fallthrough
CT: control target
= control target key end

     0   :  { %13 = vsyncpa [#allocation3], 0  ;;  %s2045_s0 = inlined_call_operand.vmem [shape: bf16[64,16], index: 0, kind: input, shape index: {}]   ;;  %s2046_s1 = inlined_call_operand.vmem [shape: bf16[16,128], index: 1, kind: input, shape index: {}]   ;;  %s2047_s2 = inlined_call_operand.vmem [shape: f32[1,128], index: 2, kind: input, shape index: {}]   ;;  %s2048_s3 = inlined_call_operand.vmem [shape: bf16[32,256], index: 3, kind: input, shape index: {}]   ;;  %s2049_s4 = inlined_call_operand.hbm [shape: bf16[32,128], index: 4, kind: input, shape index: {}]   ;;  %s2050_s5 = inlined_call_operand.vmem [shape: f32[1,128], index: 5, kind: input, shape index: {}]   ;;  %s2051_s6 = inlined_call_operand.hbm [shape: bf16[32,128], index: 6, kind: input, shape index: {}]   ;;  %s2052_s7 = inlined_call_operand.vmem [shape: f32[1,128], index: 7, kind: input, shape index: {}]   ;;  %s2053_s8 = inlined_call_operand.hbm [shape: f32[64,128], index: 8, kind: output, shape index: {}]  }
   0x1   :  { %14 = vsyncpa [#allocation6], 0 }
   0x2   :  { %15 = vsyncpa [#allocation4], 0  ;;  %s28_s29 = sshll.u32 %s2049_s4, 4  ;;  %s1652_s30 = smov [#allocation2]   ;;  %s29_s29 = int_to_ptr.hbm [resolvable:$true] %s28_s29 }
   0x3   :  { %s30_s9 = sshll.u32 %s1652_s30, 4  ;;  %s43_s12 = sshll.u32 %s2051_s6, 4  ;;  %s31_s9 = int_to_ptr.vmem [resolvable:$true] %s30_s9  ;;  %s44_s12 = int_to_ptr.hbm [resolvable:$true] %s43_s12 }
   0x4   :  { %s1653_s13 = smov 64   ;;  %s1654_s14 = smov 4  }
   0x5   :  { %36 = dma.hbm_to_vmem [thread:$0]  %s29_s29, 256, %s31_s9, [#allocation3], %s1653_s13, %s1653_s13, %s1654_s14  }
   0x6   :  { %s1655_s15 = smov [#allocation5]  }
   0x7   :  { %s45_s16 = sshll.u32 %s1655_s15, 4  ;;  %s46_s16 = int_to_ptr.vmem [resolvable:$true] %s45_s16 }
   0x8   :  { %51 = dma.hbm_to_vmem [thread:$0]  %s44_s12, 256, %s46_s16, [#allocation6], %s1653_s13, %s1653_s13, %s1654_s14  }
   0x9   :  { %1646 = dma.done.wait [#allocation3], 256  }
   0xa   :  { %1647 = vsyncadd [#allocation3], 4294967040 }
   0xb   :  { %1648 = dma.done.wait [#allocation6], 256  }
   0xc   :  { %1649 = vsyncadd [#allocation6], 4294967040  ;;  %v1426_v0 = vld [vmem:[%s2046_s1] sm:$0xff]  ;;  %vm115_vm0 = vcmask 130048   ;;  %s1656_s1 = smov 32   ;;  %v1425_v25 = vld [vmem:[%s2045_s0 + $0x18] sm:$0xff] }
   0xd   :  { %v1422_v1 = vld [vmem:[%s2045_s0] sm:$0xff]  ;;  %135 = vmatpush.bf16.msra.mxu0 %v1426_v0  ;;  %1429 = vmatpush.bf16.msra.mxu1 %v1426_v0  ;;  %v1738_v26 = vld [vmem:[#allocation2 + $0x8] sm:$0xff]  ;;  %v1353_v28 = vld [vmem:[%s2048_s3 + $0x10] sm:$0xf]  ;;  %v1657_v40 = vmov 0   ;;  %vm219_vm5 = vcmask 261120  }
   0xe   :  { %v1726_v2 = vld [vmem:[%s2047_s2] ss:$0 sm:$0xff]  ;;  %v1419_v29 = vld [vmem:[%s2048_s3 + $0x14] sm:$0xf0]  ;;  %270 = vmatpush.bf16.msra.mxu3 %v1738_v26  ;;  %v1417_v32 = vld [vmem:[%s2048_s3 + $0x4] sm:$0xf0] }
   0xf   :  { %v1740_v27 = vld [vmem:[#allocation2] sm:$0xff]  ;;  %v1753_v31 = vor.u32 %v1419_v29, %v1353_v28  ;;  %v1418_v33 = vld [vmem:[%s2048_s3 + $0x14] sm:$0xf]  ;;  %v1355_v34 = vld [vmem:[%s2048_s3 + $0x18] sm:$0xf0]  ;;  %s1304_s25 = sshll.u32 %s2053_s8, 4  ;;  %s1305_s25 = int_to_ptr.hbm [resolvable:$true] %s1304_s25 }
  0x10   :  { %1338 = vmatmul.msk.bf16.vlgmr.msra.gmra.mxu0 %vm115_vm0, %v1422_v1  ;;  %v1345_v30 = vld [vmem:[%s2048_s3] sm:$0xf]  ;;  %1341 = vmatmul.msk.bf16.vlgmr.msra.gmra.mxu1 %vm115_vm0, %v1425_v25  ;;  %v1764_v35 = vor.u32 %v1418_v33, %v1355_v34  ;;  %v1416_v36 = vld [vmem:[%s2048_s3 + $0x4] sm:$0xf]  ;;  %v1347_v37 = vld [vmem:[%s2048_s3 + $0x8] sm:$0xf0] }
  0x11   :  { %229 = vmatpush.bf16.msrb.mxu1 %v1753_v31  ;;  %v1773_v38 = vor.u32 %v1417_v32, %v1345_v30  ;;  %758 = vmatpush.bf16.msrb.mxu0 %v1753_v31  ;;  %v1777_v39 = vor.u32 %v1416_v36, %v1347_v37  ;;  %v1807_v49 = vld [vmem:[%s2050_s5] ss:$0 sm:$0xff]  ;;  %s1659_s26 = smov 128   ;;  %s1660_s27 = smov 8  }
  0x12   :  { %242 = vmatpush.bf16.msra.mxu2 %v1764_v35  ;;  %271 = vmatpush.bf16.msra.mxu3 %v1740_v27 }
  0x15   :  { %230 = vmatpush.bf16.msrb.mxu1 %v1773_v38  ;;  %759 = vmatpush.bf16.msrb.mxu0 %v1773_v38 }
  0x16   :  { %400 = vmatpush.bf16.msrb.mxu3 %v1738_v26  ;;  %243 = vmatpush.bf16.msra.mxu2 %v1777_v39 }
  0x17   :  { %272 = vmatmul.bf16.vlgmr.msra.gmra.mxu3 %v1657_v40 }
  0x19   :  { %368 = vmatpush.bf16.msra.mxu1 %v1753_v31  ;;  %901 = vmatpush.bf16.msra.mxu0 %v1764_v35 }
  0x1a   :  { %381 = vmatpush.bf16.msrb.mxu2 %v1764_v35  ;;  %401 = vmatpush.bf16.msrb.mxu3 %v1740_v27 }
  0x1d   :  { %369 = vmatpush.bf16.msra.mxu1 %v1773_v38  ;;  %902 = vmatpush.bf16.msra.mxu0 %v1777_v39 }
  0x1e   :  { %530 = vmatpush.bf16.msra.mxu3 %v1738_v26  ;;  %382 = vmatpush.bf16.msrb.mxu2 %v1777_v39 }
  0x22   :  { %531 = vmatpush.bf16.msra.mxu3 %v1740_v27 }
  0x8d   :  { %v137_v3 = vpop.f32.mrf.mxu0  ;;  %v1800_v47 = vpop.f32.mrf.mxu1 }
  0x8e   :  { %v138_v4 = vadd.f32 %v1726_v2, %v137_v3 }
  0x90   :  { %1444 = vtanh.f32 %v138_v4  ;;  %v1342_v6 = vmul.f32 -1.442695, %v138_v4 }
  0x92   :  { %1446 = vpow2.f32 %v1342_v6 }
  0x95   :  { %v1802_v48 = vpop.f32.mrf.mxu1  ;;  %v139_v53 = vpop.f32.mrf.mxu0 }
  0x96   :  { %v1445_v5 = vpop.eup %1444  ;;  %v140_v55 = vadd.f32 %v1726_v2, %v139_v53 }
  0x97   :  { %180 = vrot.lane.b32.xlu0 %v1445_v5, %s1653_s13 }
  0x98   :  { %v1447_v7 = vpop.eup %1446 }
  0x99   :  { %v161_v8 = vadd.f32 1.0, %v1447_v7 }
  0x9a   :  { %v273_v44 = vpop.f32.mrf.mxu3 }
  0x9b   :  { %1448 = vrcp.f32 %v161_v8  ;;  %v173_v14 = vand.u32 2147483648, %v161_v8  ;;  %vm167_vm2 = vweird.f32 %v161_v8  ;;  %v171_v15 = vand.u32 2147483647, %v161_v8 }
  0x9d   :  { %v174_v17 = vor.u32 1.1754944e-38, %v173_v14  ;;  %vm172_vm4 = vcmp.eq.f32.partialorder %v171_v15, 8.507059e+37 }
  0xa1   :  { %v1449_v9 = vpop.eup %1448 }
  0xa2   :  { %v163_v10 = vmul.f32 %v1449_v9, %v161_v8  ;;  %vm168_vm1 = vweird.f32 %v1449_v9  ;;  %v275_v46 = vpop.f32.mrf.mxu3 }
  0xa3   :  { %vm169_vm3 = vmor %vm167_vm2, %vm168_vm1 }
  0xa4   :  { %v164_v11 = vsub.f32 1.0, %v163_v10 }
  0xa6   :  { %v165_v12 = vmul.f32 %v1449_v9, %v164_v11 }
  0xa8   :  { %v166_v13 = vadd.f32 %v1449_v9, %v165_v12 }
  0xaa   :  { %v170_v16 = vsel %vm169_vm3, %v1449_v9, %v166_v13 }
  0xab   :  { %v175_v19 = vsel %vm172_vm4, %v174_v17, %v170_v16 }
  0xac   :  { %v178_v21 = vmul.f32 0.0, %v175_v19 }
 0x109   :  { %v181_v18 = vpop.permute.xlu0 %180 }
 0x10a   :  { %v183_v20 = vmul.f32 %v181_v18, %v175_v19 }
 0x10c   :  { %185 = vrot.lane.b32.xlu0 %v183_v20, %s1656_s1 }
 0x17e   :  { %v186_v22 = vpop.permute.xlu0 %185 }
 0x17f   :  { %v1731_v23 = vadd.f32 %v186_v22, %v178_v21 }
 0x181   :  { %1450 = vtanh.f32 %v1731_v23 }
 0x187   :  { %v1451_v24 = vpop.eup %1450 }
 0x188   :  { %191 = vrot.lane.b32.xlu1 %v1451_v24, %s1653_s13 }
 0x1fa   :  { %v192_v41 = vpop.permute.xlu1 %191 }
 0x1fb   :  { %v194_v42 = vmul.f32 %v192_v41, %v175_v19 }
 0x1fd   :  { %v195_v43 = vpack.c.bf16 %v194_v42, %v194_v42 }
 0x1ff   :  { %197 = vrot.lane.b32.xlu1 %v195_v43, %s1656_s1 }
 0x271   :  { %v198_v45 = vpop.permute.xlu1 %197 }
 0x272   :  { %1359 = vmatmul.msk.bf16.vlgmr.msrb.gmra.mxu1 %vm219_vm5, %v198_v45  ;;  %1360 = vmatmul.msk.bf16.vlgmr.msra.gmra.mxu2 %vm219_vm5, %v198_v45 }
 0x273   :  { %511 = vmatpush.bf16.msra.mxu2 %v1764_v35  ;;  %498 = vmatpush.bf16.msrb.mxu1 %v1753_v31 }
 0x277   :  { %512 = vmatpush.bf16.msra.mxu2 %v1777_v39  ;;  %499 = vmatpush.bf16.msrb.mxu1 %v1773_v38 }
 0x2ef   :  { %v232_v50 = vpop.f32.mrf.mxu1 }
 0x2f0   :  { %v277_v51 = vadd.f32 %v273_v44, %v232_v50 }
 0x2f2   :  { %v278_v52 = vadd.f32 %v1807_v49, %v277_v51  ;;  %v1423_v51 = vld [vmem:[%s2045_s0 + $0x8] sm:$0xff] }
 0x2f3   :  { %1339 = vmatmul.msk.bf16.gmra.mxu0 %vm115_vm0, %v1423_v51 }
 0x2f4   :  { %1452 = vtanh.f32 %v278_v52  ;;  %v1369_v61 = vmul.f32 -1.442695, %v278_v52 }
 0x2f5   :  { %v245_v54 = vpop.f32.mrf.mxu2 }
 0x2f6   :  { %v317_v57 = vadd.f32 %v245_v54, %v140_v55 }
 0x2f7   :  { %v234_v56 = vpop.f32.mrf.mxu1 }
 0x2f8   :  { %1454 = vtanh.f32 %v317_v57  ;;  %v1370_v62 = vmul.f32 -1.442695, %v317_v57 }
 0x2f9   :  { %1456 = vpow2.f32 %v1369_v61 }
 0x2fa   :  { %v1453_v58 = vpop.eup %1452  ;;  %1458 = vpow2.f32 %v1370_v62 }
 0x2fb   :  { %301 = vrot.lane.b32.xlu2 %v1453_v58, %s1653_s13 }
 0x2fd   :  { %v247_v59 = vpop.f32.mrf.mxu2 }
 0x2fe   :  { %v1455_v60 = vpop.eup %1454 }
 0x2ff   :  { %v1457_v63 = vpop.eup %1456 }
 0x300   :  { %v282_v0 = vadd.f32 1.0, %v1457_v63  ;;  %v1459_v1 = vpop.eup %1458 }
 0x301   :  { %v321_v3 = vadd.f32 1.0, %v1459_v1 }
 0x302   :  { %1460 = vrcp.f32 %v282_v0  ;;  %v294_v12 = vand.u32 2147483648, %v282_v0  ;;  %vm288_vm7 = vweird.f32 %v282_v0  ;;  %v292_v13 = vand.u32 2147483647, %v282_v0 }
 0x303   :  { %340 = vrot.lane.b32.xlu2 %v1455_v60, %s1653_s13  ;;  %1462 = vrcp.f32 %v321_v3  ;;  %v333_v21 = vand.u32 2147483648, %v321_v3  ;;  %vm327_vm11 = vweird.f32 %v321_v3  ;;  %v331_v22 = vand.u32 2147483647, %v321_v3 }
 0x304   :  { %v295_v16 = vor.u32 1.1754944e-38, %v294_v12  ;;  %vm293_vm9 = vcmp.eq.f32.partialorder %v292_v13, 8.507059e+37 }
 0x305   :  { %v334_v25 = vor.u32 1.1754944e-38, %v333_v21  ;;  %vm332_vm13 = vcmp.eq.f32.partialorder %v331_v22, 8.507059e+37 }
 0x308   :  { %v1461_v4 = vpop.eup %1460 }
 0x309   :  { %v284_v5 = vmul.f32 %v1461_v4, %v282_v0  ;;  %v1463_v7 = vpop.eup %1462  ;;  %vm289_vm6 = vweird.f32 %v1461_v4 }
 0x30a   :  { %v323_v9 = vmul.f32 %v1463_v7, %v321_v3  ;;  %vm290_vm8 = vmor %vm288_vm7, %vm289_vm6  ;;  %vm328_vm10 = vweird.f32 %v1463_v7 }
 0x30b   :  { %v285_v6 = vsub.f32 1.0, %v284_v5  ;;  %vm329_vm12 = vmor %vm327_vm11, %vm328_vm10 }
 0x30c   :  { %v324_v11 = vsub.f32 1.0, %v323_v9 }
 0x30d   :  { %v286_v8 = vmul.f32 %v1461_v4, %v285_v6 }
 0x30e   :  { %v325_v15 = vmul.f32 %v1463_v7, %v324_v11 }
 0x30f   :  { %v287_v10 = vadd.f32 %v1461_v4, %v286_v8 }
 0x310   :  { %v326_v20 = vadd.f32 %v1463_v7, %v325_v15 }
 0x311   :  { %v291_v14 = vsel %vm290_vm8, %v1461_v4, %v287_v10 }
 0x312   :  { %v296_v18 = vsel %vm293_vm9, %v295_v16, %v291_v14  ;;  %v330_v24 = vsel %vm329_vm12, %v1463_v7, %v326_v20 }
 0x313   :  { %v335_v29 = vsel %vm332_vm13, %v334_v25, %v330_v24  ;;  %v299_v32 = vmul.f32 0.0, %v296_v18 }
 0x314   :  { %v338_v36 = vmul.f32 %v335_v29, %v1731_v23 }
 0x355   :  { %v302_v17 = vpop.permute.xlu2 %301 }
 0x356   :  { %v304_v19 = vmul.f32 %v302_v17, %v296_v18 }
 0x358   :  { %306 = vrot.lane.b32.xlu0 %v304_v19, %s1656_s1 }
 0x35d   :  { %v341_v28 = vpop.permute.xlu2 %340 }
 0x35e   :  { %v343_v30 = vmul.f32 %v341_v28, %v335_v29 }
 0x360   :  { %345 = vrot.lane.b32.xlu1 %v343_v30, %s1656_s1 }
 0x370   :  { %v142_v57 = vpop.f32.mrf.mxu0 }
 0x371   :  { %v143_v58 = vadd.f32 %v1726_v2, %v142_v57 }
 0x3ca   :  { %v307_v33 = vpop.permute.xlu0 %306 }
 0x3cb   :  { %v1815_v34 = vadd.f32 %v307_v33, %v299_v32 }
 0x3cd   :  { %1464 = vtanh.f32 %v1815_v34 }
 0x3d2   :  { %v346_v37 = vpop.permute.xlu1 %345 }
 0x3d3   :  { %v1465_v40 = vpop.eup %1464  ;;  %v1819_v41 = vadd.f32 %v346_v37, %v338_v36 }
 0x3d4   :  { %312 = vrot.lane.b32.xlu2 %v1465_v40, %s1653_s13 }
 0x3d5   :  { %1466 = vtanh.f32 %v1819_v41 }
 0x3db   :  { %v1467_v42 = vpop.eup %1466 }
 0x3dc   :  { %351 = vrot.lane.b32.xlu0 %v1467_v42, %s1653_s13 }
 0x42e   :  { %v313_v43 = vpop.permute.xlu2 %312 }
 0x42f   :  { %v1824_v44 = vmul.f32 %v313_v43, %v296_v18 }
 0x431   :  { %v316_v45 = vpack.c.bf16 %v1824_v44, %v1824_v44 }
 0x433   :  { %389 = vrot.lane.b32.xlu1 %v316_v45, %s1656_s1 }
 0x44e   :  { %v352_v23 = vpop.permute.xlu0 %351 }
 0x44f   :  { %v354_v46 = vmul.f32 %v352_v23, %v335_v29 }
 0x451   :  { %v355_v50 = vpack.c.bf16 %v354_v46, %v354_v46 }
 0x453   :  { %357 = vrot.lane.b32.xlu2 %v355_v50, %s1656_s1 }
 0x4a5   :  { %v390_v52 = vpop.permute.xlu1 %389 }
 0x4a6   :  { %1373 = vmatmul.msk.bf16.vlgmr.msrb.gmra.mxu3 %vm219_vm5, %v390_v52 }
 0x4a7   :  { %660 = vmatpush.bf16.msrb.mxu3 %v1738_v26 }
 0x4ab   :  { %661 = vmatpush.bf16.msrb.mxu3 %v1740_v27 }
 0x4ad   :  { %v358_v53 = vpop.permute.xlu2 %357 }
 0x4ae   :  { %1371 = vmatmul.msk.bf16.vlgmr.msra.gmra.mxu1 %vm219_vm5, %v358_v53  ;;  %1372 = vmatmul.msk.bf16.vlgmr.msrb.gmra.mxu2 %vm219_vm5, %v358_v53 }
 0x4af   :  { %628 = vmatpush.bf16.msra.mxu1 %v1753_v31  ;;  %641 = vmatpush.bf16.msrb.mxu2 %v1764_v35 }
 0x4b3   :  { %629 = vmatpush.bf16.msra.mxu1 %v1773_v38  ;;  %642 = vmatpush.bf16.msrb.mxu2 %v1777_v39 }
 0x529   :  { %v403_v54 = vpop.f32.mrf.mxu3 }
 0x52b   :  { %v371_v55 = vpop.f32.mrf.mxu1 }
 0x52c   :  { %v407_v56 = vadd.f32 %v403_v54, %v371_v55 }
 0x52e   :  { %v408_v59 = vadd.f32 %v1807_v49, %v407_v56 }
 0x530   :  { %1468 = vtanh.f32 %v408_v59  ;;  %v1374_v4 = vmul.f32 -1.442695, %v408_v59 }
 0x531   :  { %v384_v60 = vpop.f32.mrf.mxu2  ;;  %v405_v61 = vpop.f32.mrf.mxu3 }
 0x532   :  { %v447_v62 = vadd.f32 %v384_v60, %v143_v58  ;;  %v144_v61 = vpop.f32.mrf.mxu0 }
 0x533   :  { %v373_v63 = vpop.f32.mrf.mxu1 }
 0x534   :  { %1470 = vtanh.f32 %v447_v62  ;;  %v1375_v5 = vmul.f32 -1.442695, %v447_v62 }
 0x535   :  { %1472 = vpow2.f32 %v1374_v4 }
 0x536   :  { %v1469_v0 = vpop.eup %1468  ;;  %1474 = vpow2.f32 %v1375_v5 }
 0x537   :  { %431 = vrot.lane.b32.xlu0 %v1469_v0, %s1653_s13  ;;  %v145_v0 = vadd.f32 %v1726_v2, %v144_v61 }
 0x539   :  { %v386_v1 = vpop.f32.mrf.mxu2 }
 0x53a   :  { %v1471_v3 = vpop.eup %1470 }
 0x53b   :  { %470 = vrot.lane.b32.xlu1 %v1471_v3, %s1653_s13  ;;  %v1473_v6 = vpop.eup %1472 }
 0x53c   :  { %v412_v7 = vadd.f32 1.0, %v1473_v6  ;;  %v1475_v8 = vpop.eup %1474 }
 0x53d   :  { %v451_v9 = vadd.f32 1.0, %v1475_v8 }
 0x53e   :  { %1476 = vrcp.f32 %v412_v7  ;;  %v424_v19 = vand.u32 2147483648, %v412_v7  ;;  %vm418_vm15 = vweird.f32 %v412_v7  ;;  %v422_v20 = vand.u32 2147483647, %v412_v7 }
 0x53f   :  { %1478 = vrcp.f32 %v451_v9  ;;  %v463_v25 = vand.u32 2147483648, %v451_v9  ;;  %vm457_vm4 = vweird.f32 %v451_v9  ;;  %v461_v28 = vand.u32 2147483647, %v451_v9 }
 0x540   :  { %v425_v24 = vor.u32 1.1754944e-38, %v424_v19  ;;  %vm423_vm3 = vcmp.eq.f32.partialorder %v422_v20, 8.507059e+37 }
 0x541   :  { %v464_v36 = vor.u32 1.1754944e-38, %v463_v25  ;;  %vm462_vm7 = vcmp.eq.f32.partialorder %v461_v28, 8.507059e+37 }
 0x544   :  { %v1477_v10 = vpop.eup %1476 }
 0x545   :  { %v414_v11 = vmul.f32 %v1477_v10, %v412_v7  ;;  %v1479_v12 = vpop.eup %1478  ;;  %vm419_vm14 = vweird.f32 %v1477_v10 }
 0x546   :  { %v453_v14 = vmul.f32 %v1479_v12, %v451_v9  ;;  %vm420_vm1 = vmor %vm418_vm15, %vm419_vm14  ;;  %vm458_vm2 = vweird.f32 %v1479_v12 }
 0x547   :  { %v415_v13 = vsub.f32 1.0, %v414_v11  ;;  %vm459_vm6 = vmor %vm457_vm4, %vm458_vm2 }
 0x548   :  { %v454_v16 = vsub.f32 1.0, %v453_v14 }
 0x549   :  { %v416_v15 = vmul.f32 %v1477_v10, %v415_v13 }
 0x54a   :  { %v455_v18 = vmul.f32 %v1479_v12, %v454_v16 }
 0x54b   :  { %v417_v17 = vadd.f32 %v1477_v10, %v416_v15 }
 0x54c   :  { %v456_v22 = vadd.f32 %v1479_v12, %v455_v18 }
 0x54d   :  { %v421_v21 = vsel %vm420_vm1, %v1477_v10, %v417_v17 }
 0x54e   :  { %v426_v30 = vsel %vm423_vm3, %v425_v24, %v421_v21  ;;  %v460_v33 = vsel %vm459_vm6, %v1479_v12, %v456_v22 }
 0x54f   :  { %v465_v40 = vsel %vm462_vm7, %v464_v36, %v460_v33  ;;  %v429_v43 = vmul.f32 %v426_v30, %v1815_v34 }
 0x550   :  { %v468_v50 = vmul.f32 %v465_v40, %v1819_v41 }
 0x5a9   :  { %v432_v29 = vpop.permute.xlu0 %431 }
 0x5aa   :  { %v434_v32 = vmul.f32 %v432_v29, %v426_v30 }
 0x5ac   :  { %436 = vrot.lane.b32.xlu2 %v434_v32, %s1656_s1 }
 0x5ad   :  { %v471_v37 = vpop.permute.xlu1 %470 }
 0x5ae   :  { %v473_v42 = vmul.f32 %v471_v37, %v465_v40 }
 0x5b0   :  { %475 = vrot.lane.b32.xlu0 %v473_v42, %s1656_s1 }
 0x606   :  { %v437_v45 = vpop.permute.xlu2 %436 }
 0x607   :  { %v1850_v23 = vadd.f32 %v437_v45, %v429_v43 }
 0x609   :  { %1480 = vtanh.f32 %v1850_v23 }
 0x60f   :  { %v1481_v46 = vpop.eup %1480 }
 0x610   :  { %442 = vrot.lane.b32.xlu1 %v1481_v46, %s1653_s13 }
 0x622   :  { %v476_v51 = vpop.permute.xlu0 %475 }
 0x623   :  { %v1855_v52 = vadd.f32 %v476_v51, %v468_v50 }
 0x625   :  { %1482 = vtanh.f32 %v1855_v52 }
 0x62b   :  { %v1483_v53 = vpop.eup %1482 }
 0x62c   :  { %481 = vrot.lane.b32.xlu2 %v1483_v53, %s1653_s13 }
 0x682   :  { %v443_v54 = vpop.permute.xlu1 %442 }
 0x683   :  { %v1859_v34 = vmul.f32 %v443_v54, %v426_v30 }
 0x685   :  { %v446_v55 = vpack.c.bf16 %v1859_v34, %v1859_v34 }
 0x686   :  { %v482_v56 = vpop.permute.xlu2 %481 }
 0x687   :  { %v484_v57 = vmul.f32 %v482_v56, %v465_v40  ;;  %519 = vrot.lane.b32.xlu0 %v446_v55, %s1656_s1 }
 0x689   :  { %v485_v58 = vpack.c.bf16 %v484_v57, %v484_v57 }
 0x68b   :  { %487 = vrot.lane.b32.xlu1 %v485_v58, %s1656_s1 }
 0x6f9   :  { %v520_v41 = vpop.permute.xlu0 %519 }
 0x6fa   :  { %1378 = vmatmul.msk.bf16.vlgmr.msra.gmra.mxu3 %vm219_vm5, %v520_v41 }
 0x6fb   :  { %888 = vmatpush.bf16.msra.mxu3 %v1753_v31 }
 0x6fd   :  { %v488_v59 = vpop.permute.xlu1 %487 }
 0x6fe   :  { %1376 = vmatmul.msk.bf16.vlgmr.msrb.gmra.mxu1 %vm219_vm5, %v488_v59  ;;  %1377 = vmatmul.msk.bf16.vlgmr.msra.gmra.mxu2 %vm219_vm5, %v488_v59 }
 0x6ff   :  { %771 = vmatpush.bf16.msrb.mxu1 %v1764_v35  ;;  %790 = vmatpush.bf16.msra.mxu2 %v1738_v26 }
 0x700   :  { %889 = vmatpush.bf16.msra.mxu3 %v1773_v38 }
 0x703   :  { %772 = vmatpush.bf16.msrb.mxu1 %v1777_v39  ;;  %791 = vmatpush.bf16.msra.mxu2 %v1740_v27 }
 0x77b   :  { %v501_v60 = vpop.f32.mrf.mxu1 }
 0x77d   :  { %v533_v62 = vpop.f32.mrf.mxu3 }
 0x77e   :  { %v537_v63 = vadd.f32 %v533_v62, %v501_v60 }
 0x780   :  { %v538_v1 = vadd.f32 %v1807_v49, %v537_v63 }
 0x781   :  { %v514_v3 = vpop.f32.mrf.mxu2 }
 0x782   :  { %1484 = vtanh.f32 %v538_v1  ;;  %v577_v4 = vadd.f32 %v514_v3, %v145_v0  ;;  %v1379_v10 = vmul.f32 -1.442695, %v538_v1  ;;  %v1424_v1 = vld [vmem:[%s2045_s0 + $0x10] sm:$0xff] }
 0x783   :  { %v503_v5 = vpop.f32.mrf.mxu1  ;;  %1340 = vmatmul.msk.bf16.gmra.mxu0 %vm115_vm0, %v1424_v1 }
 0x784   :  { %1486 = vtanh.f32 %v577_v4  ;;  %v1380_v15 = vmul.f32 -1.442695, %v577_v4 }
 0x785   :  { %v535_v6 = vpop.f32.mrf.mxu3  ;;  %1488 = vpow2.f32 %v1379_v10 }
 0x788   :  { %v1485_v7 = vpop.eup %1484 }
 0x789   :  { %561 = vrot.lane.b32.xlu2 %v1485_v7, %s1653_s13  ;;  %v516_v8 = vpop.f32.mrf.mxu2 }
 0x78a   :  { %v1487_v9 = vpop.eup %1486 }
 0x78b   :  { %600 = vrot.lane.b32.xlu0 %v1487_v9, %s1653_s13  ;;  %v1489_v11 = vpop.eup %1488 }
 0x78c   :  { %v542_v12 = vadd.f32 1.0, %v1489_v11 }
 0x78e   :  { %1490 = vrcp.f32 %v542_v12  ;;  %v554_v20 = vand.u32 2147483648, %v542_v12  ;;  %vm548_vm9 = vweird.f32 %v542_v12  ;;  %v552_v22 = vand.u32 2147483647, %v542_v12 }
 0x78f   :  { %1492 = vpow2.f32 %v1380_v15 }
 0x790   :  { %v555_v25 = vor.u32 1.1754944e-38, %v554_v20  ;;  %vm553_vm11 = vcmp.eq.f32.partialorder %v552_v22, 8.507059e+37 }
 0x794   :  { %v1491_v13 = vpop.eup %1490 }
 0x795   :  { %v544_v14 = vmul.f32 %v1491_v13, %v542_v12  ;;  %v1493_v18 = vpop.eup %1492  ;;  %vm549_vm8 = vweird.f32 %v1491_v13 }
 0x796   :  { %v581_v21 = vadd.f32 1.0, %v1493_v18  ;;  %vm550_vm10 = vmor %vm548_vm9, %vm549_vm8 }
 0x797   :  { %v545_v16 = vsub.f32 1.0, %v544_v14 }
 0x798   :  { %1494 = vrcp.f32 %v581_v21  ;;  %v593_v42 = vand.u32 2147483648, %v581_v21  ;;  %vm587_vm13 = vweird.f32 %v581_v21  ;;  %v591_v43 = vand.u32 2147483647, %v581_v21 }
 0x799   :  { %v546_v17 = vmul.f32 %v1491_v13, %v545_v16 }
 0x79a   :  { %v594_v46 = vor.u32 1.1754944e-38, %v593_v42  ;;  %vm592_vm15 = vcmp.eq.f32.partialorder %v591_v43, 8.507059e+37 }
 0x79b   :  { %v547_v19 = vadd.f32 %v1491_v13, %v546_v17 }
 0x79d   :  { %v551_v24 = vsel %vm550_vm10, %v1491_v13, %v547_v19 }
 0x79e   :  { %v556_v29 = vsel %vm553_vm11, %v555_v25, %v551_v24  ;;  %v1495_v32 = vpop.eup %1494 }
 0x79f   :  { %v583_v33 = vmul.f32 %v1495_v32, %v581_v21  ;;  %vm588_vm12 = vweird.f32 %v1495_v32  ;;  %v559_v54 = vmul.f32 %v556_v29, %v1850_v23 }
 0x7a0   :  { %vm589_vm14 = vmor %vm587_vm13, %vm588_vm12 }
 0x7a1   :  { %v584_v36 = vsub.f32 1.0, %v583_v33 }
 0x7a3   :  { %v585_v37 = vmul.f32 %v1495_v32, %v584_v36 }
 0x7a5   :  { %v586_v40 = vadd.f32 %v1495_v32, %v585_v37 }
 0x7a7   :  { %v590_v45 = vsel %vm589_vm14, %v1495_v32, %v586_v40 }
 0x7a8   :  { %v595_v51 = vsel %vm592_vm15, %v594_v46, %v590_v45 }
 0x7a9   :  { %v598_v57 = vmul.f32 %v595_v51, %v1855_v52 }
 0x7e3   :  { %v562_v28 = vpop.permute.xlu2 %561 }
 0x7e4   :  { %v564_v30 = vmul.f32 %v562_v28, %v556_v29 }
 0x7e6   :  { %566 = vrot.lane.b32.xlu1 %v564_v30, %s1656_s1 }
 0x7fd   :  { %v601_v50 = vpop.permute.xlu0 %600 }
 0x7fe   :  { %v603_v53 = vmul.f32 %v601_v50, %v595_v51 }
 0x800   :  { %605 = vrot.lane.b32.xlu2 %v603_v53, %s1656_s1  ;;  %v147_v8 = vpop.f32.mrf.mxu0 }
 0x801   :  { %v148_v9 = vadd.f32 %v1726_v2, %v147_v8 }
 0x858   :  { %v567_v55 = vpop.permute.xlu1 %566 }
 0x859   :  { %v1881_v56 = vadd.f32 %v567_v55, %v559_v54 }
 0x85a   :  { %v606_v58 = vpop.permute.xlu2 %605 }
 0x85b   :  { %1496 = vtanh.f32 %v1881_v56  ;;  %v1885_v41 = vadd.f32 %v606_v58, %v598_v57 }
 0x85d   :  { %1498 = vtanh.f32 %v1885_v41 }
 0x861   :  { %v1497_v59 = vpop.eup %1496 }
 0x862   :  { %572 = vrot.lane.b32.xlu0 %v1497_v59, %s1653_s13 }
 0x863   :  { %v1499_v60 = vpop.eup %1498 }
 0x864   :  { %611 = vrot.lane.b32.xlu1 %v1499_v60, %s1653_s13 }
 0x8d4   :  { %v573_v61 = vpop.permute.xlu0 %572 }
 0x8d5   :  { %v1890_v23 = vmul.f32 %v573_v61, %v556_v29 }
 0x8d6   :  { %v612_v52 = vpop.permute.xlu1 %611 }
 0x8d7   :  { %v576_v62 = vpack.c.bf16 %v1890_v23, %v1890_v23  ;;  %v614_v63 = vmul.f32 %v612_v52, %v595_v51 }
 0x8d9   :  { %649 = vrot.lane.b32.xlu2 %v576_v62, %s1656_s1  ;;  %v615_v0 = vpack.c.bf16 %v614_v63, %v614_v63 }
 0x8db   :  { %617 = vrot.lane.b32.xlu0 %v615_v0, %s1656_s1 }
 0x933   :  { %v650_v3 = vpop.permute.xlu2 %649 }
 0x934   :  { %1383 = vmatmul.msk.bf16.vlgmr.msrb.gmra.mxu3 %vm219_vm5, %v650_v3 }
 0x935   :  { %1031 = vmatpush.bf16.msrb.mxu3 %v1764_v35 }
 0x939   :  { %1032 = vmatpush.bf16.msrb.mxu3 %v1777_v39 }
 0x94d   :  { %v618_v4 = vpop.permute.xlu0 %617 }
 0x94e   :  { %1381 = vmatmul.msk.bf16.vlgmr.msra.gmra.mxu1 %vm219_vm5, %v618_v4  ;;  %1382 = vmatmul.msk.bf16.vlgmr.msrb.gmra.mxu2 %vm219_vm5, %v618_v4 }
 0x94f   :  { %920 = vmatpush.bf16.msra.mxu1 %v1738_v26  ;;  %1018 = vmatpush.bf16.msrb.mxu2 %v1753_v31 }
 0x953   :  { %921 = vmatpush.bf16.msra.mxu1 %v1740_v27  ;;  %1019 = vmatpush.bf16.msrb.mxu2 %v1773_v38 }
 0x9b7   :  { %v663_v5 = vpop.f32.mrf.mxu3 }
 0x9bf   :  { %v665_v6 = vpop.f32.mrf.mxu3 }
 0x9cb   :  { %v631_v7 = vpop.f32.mrf.mxu1 }
 0x9cc   :  { %v667_v35 = vadd.f32 %v663_v5, %v631_v7 }
 0x9ce   :  { %v668_v39 = vadd.f32 %v1807_v49, %v667_v35 }
 0x9d0   :  { %1500 = vtanh.f32 %v668_v39  ;;  %v1384_v19 = vmul.f32 -1.442695, %v668_v39 }
 0x9d1   :  { %v644_v10 = vpop.f32.mrf.mxu2 }
 0x9d2   :  { %v707_v11 = vadd.f32 %v644_v10, %v148_v9  ;;  %v149_v9 = vpop.f32.mrf.mxu0 }
 0x9d3   :  { %v633_v12 = vpop.f32.mrf.mxu1  ;;  %v150_v10 = vadd.f32 %v1726_v2, %v149_v9 }
 0x9d4   :  { %1502 = vtanh.f32 %v707_v11  ;;  %v1385_v16 = vmul.f32 -1.442695, %v707_v11 }
 0x9d6   :  { %v1501_v13 = vpop.eup %1500  ;;  %1504 = vpow2.f32 %v1385_v16 }
 0x9d7   :  { %691 = vrot.lane.b32.xlu1 %v1501_v13, %s1653_s13 }
 0x9d9   :  { %v646_v14 = vpop.f32.mrf.mxu2 }
 0x9da   :  { %v1503_v15 = vpop.eup %1502 }
 0x9db   :  { %730 = vrot.lane.b32.xlu2 %v1503_v15, %s1653_s13 }
 0x9dc   :  { %v1505_v17 = vpop.eup %1504 }
 0x9dd   :  { %v711_v18 = vadd.f32 1.0, %v1505_v17 }
 0x9df   :  { %1506 = vrcp.f32 %v711_v18  ;;  %v723_v30 = vand.u32 2147483648, %v711_v18  ;;  %vm717_vm1 = vweird.f32 %v711_v18  ;;  %v721_v32 = vand.u32 2147483647, %v711_v18 }
 0x9e0   :  { %1508 = vpow2.f32 %v1384_v19 }
 0x9e1   :  { %v724_v37 = vor.u32 1.1754944e-38, %v723_v30  ;;  %vm722_vm3 = vcmp.eq.f32.partialorder %v721_v32, 8.507059e+37 }
 0x9e5   :  { %v1507_v20 = vpop.eup %1506 }
 0x9e6   :  { %v713_v21 = vmul.f32 %v1507_v20, %v711_v18  ;;  %v1509_v22 = vpop.eup %1508  ;;  %vm718_vm0 = vweird.f32 %v1507_v20 }
 0x9e7   :  { %v672_v25 = vadd.f32 1.0, %v1509_v22  ;;  %vm719_vm2 = vmor %vm717_vm1, %vm718_vm0 }
 0x9e8   :  { %v714_v24 = vsub.f32 1.0, %v713_v21 }
 0x9e9   :  { %1510 = vrcp.f32 %v672_v25  ;;  %v684_v53 = vand.u32 2147483648, %v672_v25  ;;  %vm678_vm6 = vweird.f32 %v672_v25  ;;  %v682_v54 = vand.u32 2147483647, %v672_v25 }
 0x9ea   :  { %v715_v28 = vmul.f32 %v1507_v20, %v714_v24 }
 0x9eb   :  { %v685_v57 = vor.u32 1.1754944e-38, %v684_v53  ;;  %vm683_vm8 = vcmp.eq.f32.partialorder %v682_v54, 8.507059e+37 }
 0x9ec   :  { %v716_v29 = vadd.f32 %v1507_v20, %v715_v28 }
 0x9ee   :  { %v720_v33 = vsel %vm719_vm2, %v1507_v20, %v716_v29 }
 0x9ef   :  { %v1511_v36 = vpop.eup %1510  ;;  %v725_v42 = vsel %vm722_vm3, %v724_v37, %v720_v33 }
 0x9f0   :  { %v674_v45 = vmul.f32 %v1511_v36, %v672_v25  ;;  %vm679_vm4 = vweird.f32 %v1511_v36  ;;  %v728_v61 = vmul.f32 %v725_v42, %v1885_v41 }
 0x9f1   :  { %vm680_vm7 = vmor %vm678_vm6, %vm679_vm4 }
 0x9f2   :  { %v675_v46 = vsub.f32 1.0, %v674_v45 }
 0x9f4   :  { %v676_v50 = vmul.f32 %v1511_v36, %v675_v46 }
 0x9f6   :  { %v677_v51 = vadd.f32 %v1511_v36, %v676_v50 }
 0x9f8   :  { %v681_v55 = vsel %vm680_vm7, %v1511_v36, %v677_v51 }
 0x9f9   :  { %v686_v59 = vsel %vm683_vm8, %v685_v57, %v681_v55 }
 0x9fa   :  { %v689_v0 = vmul.f32 %v686_v59, %v1881_v56 }
 0xa35   :  { %v731_v40 = vpop.permute.xlu2 %730 }
 0xa36   :  { %v733_v43 = vmul.f32 %v731_v40, %v725_v42 }
 0xa38   :  { %735 = vrot.lane.b32.xlu1 %v733_v43, %s1656_s1 }
 0xa49   :  { %v692_v58 = vpop.permute.xlu1 %691 }
 0xa4a   :  { %v694_v60 = vmul.f32 %v692_v58, %v686_v59 }
 0xa4c   :  { %696 = vrot.lane.b32.xlu0 %v694_v60, %s1656_s1 }
 0xaaa   :  { %v736_v62 = vpop.permute.xlu1 %735 }
 0xaab   :  { %v1916_v52 = vadd.f32 %v736_v62, %v728_v61 }
 0xaad   :  { %1512 = vtanh.f32 %v1916_v52 }
 0xab3   :  { %v1513_v63 = vpop.eup %1512 }
 0xab4   :  { %741 = vrot.lane.b32.xlu0 %v1513_v63, %s1653_s13 }
 0xabe   :  { %v697_v1 = vpop.permute.xlu0 %696 }
 0xabf   :  { %v1921_v3 = vadd.f32 %v697_v1, %v689_v0 }
 0xac1   :  { %1514 = vtanh.f32 %v1921_v3 }
 0xac7   :  { %v1515_v4 = vpop.eup %1514 }
 0xac8   :  { %702 = vrot.lane.b32.xlu2 %v1515_v4, %s1653_s13 }
 0xb22   :  { %v703_v5 = vpop.permute.xlu2 %702 }
 0xb23   :  { %v1925_v41 = vmul.f32 %v703_v5, %v686_v59 }
 0xb25   :  { %v706_v6 = vpack.c.bf16 %v1925_v41, %v1925_v41 }
 0xb26   :  { %v742_v7 = vpop.permute.xlu0 %741 }
 0xb27   :  { %v744_v8 = vmul.f32 %v742_v7, %v725_v42  ;;  %779 = vrot.lane.b32.xlu1 %v706_v6, %s1656_s1 }
 0xb29   :  { %v745_v35 = vpack.c.bf16 %v744_v8, %v744_v8 }
 0xb2b   :  { %747 = vrot.lane.b32.xlu2 %v745_v35, %s1656_s1 }
 0xb85   :  { %v748_v56 = vpop.permute.xlu2 %747 }
 0xb86   :  { %1386 = vmatmul.msk.bf16.vlgmr.msrb.gmra.mxu0 %vm219_vm5, %v748_v56  ;;  %1387 = vmatmul.msk.bf16.vlgmr.msrb.gmra.mxu1 %vm219_vm5, %v748_v56 }
 0xb87   :  { %1050 = vmatpush.bf16.msrb.mxu0 %v1738_v26  ;;  %1148 = vmatpush.bf16.msrb.mxu1 %v1753_v31 }
 0xb8b   :  { %1051 = vmatpush.bf16.msrb.mxu0 %v1740_v27  ;;  %1149 = vmatpush.bf16.msrb.mxu1 %v1773_v38 }
 0xb99   :  { %v780_v39 = vpop.permute.xlu1 %779 }
 0xb9a   :  { %1388 = vmatmul.msk.bf16.vlgmr.msra.gmra.mxu2 %vm219_vm5, %v780_v39 }
 0xb9b   :  { %1167 = vmatpush.bf16.msra.mxu2 %v1738_v26 }
 0xb9f   :  { %1168 = vmatpush.bf16.msra.mxu2 %v1740_v27 }
 0xc03   :  { %v761_v11 = vpop.f32.mrf.mxu0  ;;  %v774_v12 = vpop.f32.mrf.mxu1 }
 0xc04   :  { %v837_v13 = vadd.f32 %v774_v12, %v150_v10 }
 0xc06   :  { %1516 = vtanh.f32 %v837_v13  ;;  %v1390_v27 = vmul.f32 -1.442695, %v837_v13 }
 0xc0b   :  { %v763_v14 = vpop.f32.mrf.mxu0  ;;  %v776_v31 = vpop.f32.mrf.mxu1 }
 0xc0c   :  { %v1517_v15 = vpop.eup %1516 }
 0xc0d   :  { %860 = vrot.lane.b32.xlu0 %v1517_v15, %s1653_s13 }
 0xc1d   :  { %v793_v38 = vpop.f32.mrf.mxu2 }
 0xc1e   :  { %v797_v16 = vadd.f32 %v793_v38, %v761_v11  ;;  %v1968_v11 = vld [vmem:[%s2047_s2] ss:$0 sm:$0xff] }
 0xc1f   :  { %v153_v12 = vadd.f32 %v1968_v11, %v1800_v47 }
 0xc20   :  { %v798_v17 = vadd.f32 %v1807_v49, %v797_v16 }
 0xc22   :  { %1518 = vtanh.f32 %v798_v17  ;;  %v1389_v22 = vmul.f32 -1.442695, %v798_v17 }
 0xc23   :  { %1520 = vpow2.f32 %v1390_v27 }
 0xc25   :  { %v795_v26 = vpop.f32.mrf.mxu2 }
 0xc28   :  { %v1519_v18 = vpop.eup %1518 }
 0xc29   :  { %821 = vrot.lane.b32.xlu1 %v1519_v18, %s1653_s13  ;;  %v1521_v2 = vpop.eup %1520 }
 0xc2a   :  { %v841_v19 = vadd.f32 1.0, %v1521_v2 }
 0xc2c   :  { %1522 = vrcp.f32 %v841_v19  ;;  %v853_v30 = vand.u32 2147483648, %v841_v19  ;;  %vm847_vm10 = vweird.f32 %v841_v19  ;;  %v851_v32 = vand.u32 2147483647, %v841_v19 }
 0xc2d   :  { %1524 = vpow2.f32 %v1389_v22 }
 0xc2e   :  { %v854_v37 = vor.u32 1.1754944e-38, %v853_v30  ;;  %vm852_vm12 = vcmp.eq.f32.partialorder %v851_v32, 8.507059e+37 }
 0xc32   :  { %v1523_v20 = vpop.eup %1522 }
 0xc33   :  { %v843_v21 = vmul.f32 %v1523_v20, %v841_v19  ;;  %v1525_v28 = vpop.eup %1524  ;;  %vm848_vm9 = vweird.f32 %v1523_v20 }
 0xc34   :  { %v802_v33 = vadd.f32 1.0, %v1525_v28  ;;  %vm849_vm11 = vmor %vm847_vm10, %vm848_vm9 }
 0xc35   :  { %v844_v24 = vsub.f32 1.0, %v843_v21 }
 0xc36   :  { %1526 = vrcp.f32 %v802_v33  ;;  %v814_v54 = vand.u32 2147483648, %v802_v33  ;;  %vm808_vm14 = vweird.f32 %v802_v33  ;;  %v812_v55 = vand.u32 2147483647, %v802_v33 }
 0xc37   :  { %v845_v25 = vmul.f32 %v1523_v20, %v844_v24 }
 0xc38   :  { %v815_v58 = vor.u32 1.1754944e-38, %v814_v54  ;;  %vm813_vm0 = vcmp.eq.f32.partialorder %v812_v55, 8.507059e+37 }
 0xc39   :  { %v846_v29 = vadd.f32 %v1523_v20, %v845_v25 }
 0xc3b   :  { %v850_v36 = vsel %vm849_vm11, %v1523_v20, %v846_v29 }
 0xc3c   :  { %v855_v42 = vsel %vm852_vm12, %v854_v37, %v850_v36  ;;  %v1527_v45 = vpop.eup %1526 }
 0xc3d   :  { %v804_v46 = vmul.f32 %v1527_v45, %v802_v33  ;;  %vm809_vm13 = vweird.f32 %v1527_v45  ;;  %v858_v62 = vmul.f32 %v855_v42, %v1916_v52 }
 0xc3e   :  { %vm810_vm15 = vmor %vm808_vm14, %vm809_vm13 }
 0xc3f   :  { %v805_v50 = vsub.f32 1.0, %v804_v46 }
 0xc41   :  { %v806_v51 = vmul.f32 %v1527_v45, %v805_v50 }
 0xc43   :  { %v807_v53 = vadd.f32 %v1527_v45, %v806_v51 }
 0xc45   :  { %v811_v57 = vsel %vm810_vm15, %v1527_v45, %v807_v53 }
 0xc46   :  { %v816_v60 = vsel %vm813_vm0, %v815_v58, %v811_v57 }
 0xc47   :  { %v819_v4 = vmul.f32 %v816_v60, %v1921_v3 }
 0xc7f   :  { %v861_v40 = vpop.permute.xlu0 %860 }
 0xc80   :  { %v863_v43 = vmul.f32 %v861_v40, %v855_v42 }
 0xc82   :  { %865 = vrot.lane.b32.xlu2 %v863_v43, %s1656_s1 }
 0xc9b   :  { %v822_v59 = vpop.permute.xlu1 %821 }
 0xc9c   :  { %v824_v61 = vmul.f32 %v822_v59, %v816_v60 }
 0xc9e   :  { %826 = vrot.lane.b32.xlu0 %v824_v61, %s1656_s1 }
 0xcdc   :  { %v866_v63 = vpop.permute.xlu2 %865 }
 0xcdd   :  { %v1947_v0 = vadd.f32 %v866_v63, %v858_v62 }
 0xcdf   :  { %1528 = vtanh.f32 %v1947_v0 }
 0xce5   :  { %v1529_v1 = vpop.eup %1528 }
 0xce6   :  { %871 = vrot.lane.b32.xlu1 %v1529_v1, %s1653_s13 }
 0xd10   :  { %v827_v5 = vpop.permute.xlu0 %826 }
 0xd11   :  { %v1952_v6 = vadd.f32 %v827_v5, %v819_v4 }
 0xd13   :  { %1530 = vtanh.f32 %v1952_v6 }
 0xd19   :  { %v1531_v7 = vpop.eup %1530 }
 0xd1a   :  { %832 = vrot.lane.b32.xlu2 %v1531_v7, %s1653_s13 }
 0xd58   :  { %v872_v8 = vpop.permute.xlu1 %871 }
 0xd59   :  { %v874_v52 = vmul.f32 %v872_v8, %v855_v42 }
 0xd5b   :  { %v875_v35 = vpack.c.bf16 %v874_v52, %v874_v52 }
 0xd5d   :  { %877 = vrot.lane.b32.xlu0 %v875_v35, %s1656_s1 }
 0xd74   :  { %v833_v56 = vpop.permute.xlu2 %832 }
 0xd75   :  { %v1957_v39 = vmul.f32 %v833_v56, %v816_v60 }
 0xd77   :  { %v836_v9 = vpack.c.bf16 %v1957_v39, %v1957_v39 }
 0xd79   :  { %909 = vrot.lane.b32.xlu1 %v836_v9, %s1656_s1 }
 0xdcf   :  { %v878_v3 = vpop.permute.xlu0 %877 }
 0xdd0   :  { %1391 = vmatmul.msk.bf16.vlgmr.msra.gmra.mxu3 %vm219_vm5, %v878_v3  ;;  %1392 = vmatmul.msk.bf16.vlgmr.msra.gmra.mxu0 %vm219_vm5, %v878_v3 }
 0xdeb   :  { %v910_v10 = vpop.permute.xlu1 %909 }
 0xdec   :  { %1393 = vmatmul.msk.bf16.vlgmr.msra.gmra.mxu1 %vm219_vm5, %v910_v10 }
 0xe4d   :  { %v904_v13 = vpop.f32.mrf.mxu0 }
 0xe4e   :  { %v967_v14 = vadd.f32 %v904_v13, %v153_v12  ;;  %v155_v13 = vadd.f32 %v1968_v11, %v1802_v48 }
 0xe50   :  { %1532 = vtanh.f32 %v967_v14  ;;  %v1395_v19 = vmul.f32 -1.442695, %v967_v14 }
 0xe53   :  { %v891_v31 = vpop.f32.mrf.mxu3 }
 0xe55   :  { %v906_v15 = vpop.f32.mrf.mxu0 }
 0xe56   :  { %v1533_v38 = vpop.eup %1532 }
 0xe57   :  { %990 = vrot.lane.b32.xlu2 %v1533_v38, %s1653_s13 }
 0xe5b   :  { %v893_v16 = vpop.f32.mrf.mxu3 }
 0xe69   :  { %v923_v17 = vpop.f32.mrf.mxu1 }
 0xe6a   :  { %v927_v26 = vadd.f32 %v923_v17, %v891_v31 }
 0xe6c   :  { %v928_v18 = vadd.f32 %v1807_v49, %v927_v26 }
 0xe6e   :  { %1534 = vtanh.f32 %v928_v18  ;;  %v1394_v40 = vmul.f32 -1.442695, %v928_v18 }
 0xe6f   :  { %1536 = vpow2.f32 %v1395_v19 }
 0xe71   :  { %v925_v27 = vpop.f32.mrf.mxu1 }
 0xe72   :  { %v2002_v27 = vld [vmem:[%s2050_s5] ss:$0 sm:$0xff] }
 0xe74   :  { %v1535_v2 = vpop.eup %1534 }
 0xe75   :  { %951 = vrot.lane.b32.xlu0 %v1535_v2, %s1653_s13  ;;  %v1537_v47 = vpop.eup %1536 }
 0xe76   :  { %v971_v20 = vadd.f32 1.0, %v1537_v47 }
 0xe78   :  { %1538 = vrcp.f32 %v971_v20  ;;  %v983_v29 = vand.u32 2147483648, %v971_v20  ;;  %vm977_vm2 = vweird.f32 %v971_v20  ;;  %v981_v30 = vand.u32 2147483647, %v971_v20 }
 0xe79   :  { %1540 = vpow2.f32 %v1394_v40 }
 0xe7a   :  { %v984_v32 = vor.u32 1.1754944e-38, %v983_v29  ;;  %vm982_vm4 = vcmp.eq.f32.partialorder %v981_v30, 8.507059e+37 }
 0xe7e   :  { %v1539_v21 = vpop.eup %1538 }
 0xe7f   :  { %v973_v22 = vmul.f32 %v1539_v21, %v971_v20  ;;  %vm978_vm1 = vweird.f32 %v1539_v21  ;;  %v1541_v42 = vpop.eup %1540 }
 0xe80   :  { %vm979_vm3 = vmor %vm977_vm2, %vm978_vm1  ;;  %v932_v43 = vadd.f32 1.0, %v1541_v42 }
 0xe81   :  { %v974_v24 = vsub.f32 1.0, %v973_v22 }
 0xe82   :  { %1542 = vrcp.f32 %v932_v43  ;;  %v944_v54 = vand.u32 2147483648, %v932_v43  ;;  %vm938_vm7 = vweird.f32 %v932_v43  ;;  %v942_v55 = vand.u32 2147483647, %v932_v43 }
 0xe83   :  { %v975_v25 = vmul.f32 %v1539_v21, %v974_v24 }
 0xe84   :  { %v945_v58 = vor.u32 1.1754944e-38, %v944_v54  ;;  %vm943_vm9 = vcmp.eq.f32.partialorder %v942_v55, 8.507059e+37 }
 0xe85   :  { %v976_v28 = vadd.f32 %v1539_v21, %v975_v25 }
 0xe87   :  { %v980_v49 = vsel %vm979_vm3, %v1539_v21, %v976_v28 }
 0xe88   :  { %v985_v33 = vsel %vm982_vm4, %v984_v32, %v980_v49  ;;  %v1543_v45 = vpop.eup %1542 }
 0xe89   :  { %v934_v46 = vmul.f32 %v1543_v45, %v932_v43  ;;  %vm939_vm6 = vweird.f32 %v1543_v45  ;;  %v988_v62 = vmul.f32 %v985_v33, %v1947_v0 }
 0xe8a   :  { %vm940_vm8 = vmor %vm938_vm7, %vm939_vm6 }
 0xe8b   :  { %v935_v50 = vsub.f32 1.0, %v934_v46 }
 0xe8d   :  { %v936_v51 = vmul.f32 %v1543_v45, %v935_v50 }
 0xe8f   :  { %v937_v53 = vadd.f32 %v1543_v45, %v936_v51 }
 0xe91   :  { %v941_v57 = vsel %vm940_vm8, %v1543_v45, %v937_v53 }
 0xe92   :  { %v946_v60 = vsel %vm943_vm9, %v945_v58, %v941_v57 }
 0xe93   :  { %v949_v5 = vmul.f32 %v946_v60, %v1952_v6 }
 0xeb1   :  { %v991_v36 = vpop.permute.xlu2 %990 }
 0xeb2   :  { %v993_v37 = vmul.f32 %v991_v36, %v985_v33 }
 0xeb4   :  { %995 = vrot.lane.b32.xlu1 %v993_v37, %s1656_s1 }
 0xee7   :  { %v952_v59 = vpop.permute.xlu0 %951 }
 0xee8   :  { %v954_v61 = vmul.f32 %v952_v59, %v946_v60 }
 0xeea   :  { %956 = vrot.lane.b32.xlu2 %v954_v61, %s1656_s1 }
 0xf26   :  { %v996_v63 = vpop.permute.xlu1 %995 }
 0xf27   :  { %v1978_v1 = vadd.f32 %v996_v63, %v988_v62 }
 0xf29   :  { %1544 = vtanh.f32 %v1978_v1 }
 0xf2f   :  { %v1545_v4 = vpop.eup %1544 }
 0xf30   :  { %1001 = vrot.lane.b32.xlu0 %v1545_v4, %s1653_s13 }
 0xf44   :  { %v957_v7 = vpop.permute.xlu2 %956 }
 0xf45   :  { %v1983_v8 = vadd.f32 %v957_v7, %v949_v5 }
 0xf47   :  { %1546 = vtanh.f32 %v1983_v8 }
 0xf4d   :  { %v1547_v52 = vpop.eup %1546 }
 0xf4e   :  { %962 = vrot.lane.b32.xlu1 %v1547_v52, %s1653_s13 }
 0xfa2   :  { %v1002_v35 = vpop.permute.xlu0 %1001 }
 0xfa3   :  { %v1004_v0 = vmul.f32 %v1002_v35, %v985_v33 }
 0xfa5   :  { %v1005_v56 = vpack.c.bf16 %v1004_v0, %v1004_v0 }
 0xfa7   :  { %1007 = vrot.lane.b32.xlu2 %v1005_v56, %s1656_s1 }
 0xfc0   :  { %v963_v9 = vpop.permute.xlu1 %962 }
 0xfc1   :  { %v1988_v3 = vmul.f32 %v963_v9, %v946_v60 }
 0xfc3   :  { %v966_v10 = vpack.c.bf16 %v1988_v3, %v1988_v3 }
 0xfc5   :  { %1039 = vrot.lane.b32.xlu0 %v966_v10, %s1656_s1 }
0x1001   :  { %v1008_v6 = vpop.permute.xlu2 %1007 }
0x1002   :  { %1396 = vmatmul.msk.bf16.vlgmr.msrb.gmra.mxu2 %vm219_vm5, %v1008_v6  ;;  %1397 = vmatmul.msk.bf16.vlgmr.msrb.gmra.mxu3 %vm219_vm5, %v1008_v6 }
0x1037   :  { %v1040_v12 = vpop.permute.xlu0 %1039 }
0x1038   :  { %1398 = vmatmul.msk.bf16.vlgmr.msrb.gmra.mxu0 %vm219_vm5, %v1040_v12 }
0x1085   :  { %v1021_v14 = vpop.f32.mrf.mxu2  ;;  %v1034_v31 = vpop.f32.mrf.mxu3 }
0x1086   :  { %v1097_v15 = vadd.f32 %v1034_v31, %v155_v13 }
0x1088   :  { %1548 = vtanh.f32 %v1097_v15  ;;  %v1400_v48 = vmul.f32 -1.442695, %v1097_v15 }
0x108d   :  { %v1023_v38 = vpop.f32.mrf.mxu2  ;;  %v1036_v16 = vpop.f32.mrf.mxu3 }
0x108e   :  { %v1549_v17 = vpop.eup %1548 }
0x108f   :  { %1120 = vrot.lane.b32.xlu2 %v1549_v17, %s1653_s13 }
0x10b5   :  { %v1053_v26 = vpop.f32.mrf.mxu0 }
0x10b6   :  { %v1057_v18 = vadd.f32 %v1053_v26, %v1021_v14 }
0x10b8   :  { %v1058_v2 = vadd.f32 %v2002_v27, %v1057_v18  ;;  %v1215_v18 = vpack.c.bf16 %v1988_v3, %v1957_v39 }
0x10ba   :  { %1550 = vtanh.f32 %v1058_v2  ;;  %v1399_v40 = vmul.f32 -1.442695, %v1058_v2  ;;  %v1214_v2 = vpack.c.bf16 %v1925_v41, %v1890_v23 }
0x10bb   :  { %1552 = vpow2.f32 %v1400_v48 }
0x10bd   :  { %v1055_v11 = vpop.f32.mrf.mxu0 }
0x10c0   :  { %v1551_v19 = vpop.eup %1550 }
0x10c1   :  { %1081 = vrot.lane.b32.xlu1 %v1551_v19, %s1653_s13  ;;  %v1553_v47 = vpop.eup %1552 }
0x10c2   :  { %v1101_v20 = vadd.f32 1.0, %v1553_v47  ;;  %v1427_v47 = vld [vmem:[#allocation5] sm:$0xff] }
0x10c4   :  { %1554 = vrcp.f32 %v1101_v20  ;;  %v1113_v29 = vand.u32 2147483648, %v1101_v20  ;;  %vm1107_vm11 = vweird.f32 %v1101_v20  ;;  %v1111_v30 = vand.u32 2147483647, %v1101_v20 }
0x10c5   :  { %1556 = vpow2.f32 %v1399_v40 }
0x10c6   :  { %v1114_v32 = vor.u32 1.1754944e-38, %v1113_v29  ;;  %vm1112_vm13 = vcmp.eq.f32.partialorder %v1111_v30, 8.507059e+37 }
0x10ca   :  { %v1555_v21 = vpop.eup %1554 }
0x10cb   :  { %v1103_v22 = vmul.f32 %v1555_v21, %v1101_v20  ;;  %vm1108_vm10 = vweird.f32 %v1555_v21  ;;  %v1557_v42 = vpop.eup %1556 }
0x10cc   :  { %vm1109_vm12 = vmor %vm1107_vm11, %vm1108_vm10  ;;  %v1062_v43 = vadd.f32 1.0, %v1557_v42 }
0x10cd   :  { %v1104_v24 = vsub.f32 1.0, %v1103_v22 }
0x10ce   :  { %1558 = vrcp.f32 %v1062_v43  ;;  %v1074_v54 = vand.u32 2147483648, %v1062_v43  ;;  %vm1068_vm15 = vweird.f32 %v1062_v43  ;;  %v1072_v55 = vand.u32 2147483647, %v1062_v43 }
0x10cf   :  { %v1105_v25 = vmul.f32 %v1555_v21, %v1104_v24 }
0x10d0   :  { %v1075_v58 = vor.u32 1.1754944e-38, %v1074_v54  ;;  %vm1073_vm1 = vcmp.eq.f32.partialorder %v1072_v55, 8.507059e+37 }
0x10d1   :  { %v1106_v28 = vadd.f32 %v1555_v21, %v1105_v25 }
0x10d3   :  { %v1110_v49 = vsel %vm1109_vm12, %v1555_v21, %v1106_v28 }
0x10d4   :  { %v1115_v36 = vsel %vm1112_vm13, %v1114_v32, %v1110_v49  ;;  %v1559_v45 = vpop.eup %1558  ;;  %v1213_v32 = vpack.c.bf16 %v1859_v34, %v1824_v44 }
0x10d5   :  { %v1064_v46 = vmul.f32 %v1559_v45, %v1062_v43  ;;  %vm1069_vm14 = vweird.f32 %v1559_v45  ;;  %v1118_v62 = vmul.f32 %v1115_v36, %v1978_v1  ;;  %v1443_v43 = vld [vmem:[%s2052_s7] ss:$0 sm:$0xff]  ;;  %s1658_s7 = smov [#allocation7]  }
0x10d6   :  { %vm1070_vm0 = vmor %vm1068_vm15, %vm1069_vm14 }
0x10d7   :  { %v1065_v50 = vsub.f32 1.0, %v1064_v46 }
0x10d9   :  { %v1066_v51 = vmul.f32 %v1559_v45, %v1065_v50 }
0x10db   :  { %v1067_v53 = vadd.f32 %v1559_v45, %v1066_v51 }
0x10dd   :  { %v1071_v57 = vsel %vm1070_vm0, %v1559_v45, %v1067_v53 }
0x10de   :  { %v1076_v60 = vsel %vm1073_vm1, %v1075_v58, %v1071_v57 }
0x10df   :  { %v1079_v7 = vmul.f32 %v1076_v60, %v1983_v8 }
0x10e9   :  { %v1121_v33 = vpop.permute.xlu2 %1120 }
0x10ea   :  { %v1123_v37 = vmul.f32 %v1121_v33, %v1115_v36 }
0x10ec   :  { %1125 = vrot.lane.b32.xlu1 %v1123_v37, %s1656_s1 }
0x1133   :  { %v1082_v59 = vpop.permute.xlu1 %1081 }
0x1134   :  { %v1084_v61 = vmul.f32 %v1082_v59, %v1076_v60 }
0x1136   :  { %1086 = vrot.lane.b32.xlu0 %v1084_v61, %s1656_s1 }
0x115e   :  { %v1126_v63 = vpop.permute.xlu1 %1125 }
0x115f   :  { %v1128_v4 = vadd.f32 %v1126_v63, %v1118_v62 }
0x1161   :  { %1560 = vtanh.f32 %v1128_v4 }
0x1167   :  { %v1561_v5 = vpop.eup %1560 }
0x1168   :  { %1131 = vrot.lane.b32.xlu0 %v1561_v5, %s1653_s13 }
0x11a8   :  { %v1087_v52 = vpop.permute.xlu0 %1086 }
0x11a9   :  { %v1089_v35 = vadd.f32 %v1087_v52, %v1079_v7 }
0x11ab   :  { %1562 = vtanh.f32 %v1089_v35 }
0x11b1   :  { %v1563_v0 = vpop.eup %1562 }
0x11b2   :  { %1092 = vrot.lane.b32.xlu2 %v1563_v0, %s1653_s13 }
0x11da   :  { %v1132_v56 = vpop.permute.xlu0 %1131 }
0x11db   :  { %v1134_v9 = vmul.f32 %v1132_v56, %v1115_v36 }
0x11dd   :  { %v1135_v10 = vpack.c.bf16 %v1134_v9, %v1134_v9 }
0x11df   :  { %1137 = vrot.lane.b32.xlu2 %v1135_v10, %s1656_s1 }
0x120c   :  { %v1093_v1 = vpop.permute.xlu2 %1092 }
0x120d   :  { %v2013_v6 = vmul.f32 %v1093_v1, %v1076_v60 }
0x120f   :  { %v1096_v12 = vpack.c.bf16 %v2013_v6, %v2013_v6 }
0x1211   :  { %1156 = vrot.lane.b32.xlu1 %v1096_v12, %s1656_s1 }
0x1239   :  { %v1138_v8 = vpop.permute.xlu2 %1137 }
0x123a   :  { %1401 = vmatmul.msk.bf16.vlgmr.msrb.gmra.mxu1 %vm219_vm5, %v1138_v8 }
0x1283   :  { %v1157_v13 = vpop.permute.xlu1 %1156 }
0x1284   :  { %1402 = vmatmul.msk.bf16.vlgmr.msra.gmra.mxu2 %vm219_vm5, %v1157_v13 }
0x12b7   :  { %v1151_v14 = vpop.f32.mrf.mxu1 }
0x12bf   :  { %v1153_v31 = vpop.f32.mrf.mxu1 }
0x1307   :  { %v1170_v15 = vpop.f32.mrf.mxu2 }
0x1308   :  { %v1174_v38 = vadd.f32 %v1170_v15, %v1151_v14 }
0x130a   :  { %v1175_v16 = vadd.f32 %v2002_v27, %v1174_v38  ;;  %v1428_v27 = vld [vmem:[#allocation5 + $0x8] sm:$0xff] }
0x130b   :  { %1430 = vmatpush.bf16.msra.mxu3 %v1428_v27  ;;  %1267 = vmatpush.bf16.msra.mxu0 %v1428_v27 }
0x130c   :  { %1564 = vtanh.f32 %v1175_v16  ;;  %v1403_v48 = vmul.f32 -1.442695, %v1175_v16 }
0x130e   :  { %1566 = vpow2.f32 %v1403_v48 }
0x130f   :  { %v1172_v17 = vpop.f32.mrf.mxu2  ;;  %1431 = vmatpush.bf16.msra.mxu3 %v1427_v47  ;;  %1268 = vmatpush.bf16.msra.mxu0 %v1427_v47 }
0x1312   :  { %v1565_v26 = vpop.eup %1564 }
0x1313   :  { %1198 = vrot.lane.b32.xlu0 %v1565_v26, %s1653_s13 }
0x1314   :  { %v1567_v11 = vpop.eup %1566 }
0x1315   :  { %v1179_v19 = vadd.f32 1.0, %v1567_v11 }
0x1317   :  { %1568 = vrcp.f32 %v1179_v19  ;;  %v1191_v23 = vand.u32 2147483648, %v1179_v19  ;;  %vm1185_vm3 = vweird.f32 %v1179_v19  ;;  %v1189_v41 = vand.u32 2147483647, %v1179_v19 }
0x1319   :  { %v1192_v25 = vor.u32 1.1754944e-38, %v1191_v23  ;;  %vm1190_vm6 = vcmp.eq.f32.partialorder %v1189_v41, 8.507059e+37 }
0x131b   :  { %1233 = vrot.lane.b32.xlu0 %v1215_v18, %s1656_s1 }
0x131d   :  { %v1569_v20 = vpop.eup %1568 }
0x131e   :  { %v1181_v39 = vmul.f32 %v1569_v20, %v1179_v19  ;;  %vm1186_vm2 = vweird.f32 %v1569_v20 }
0x131f   :  { %vm1187_vm4 = vmor %vm1185_vm3, %vm1186_vm2 }
0x1320   :  { %v1182_v3 = vsub.f32 1.0, %v1181_v39 }
0x1322   :  { %v1183_v21 = vmul.f32 %v1569_v20, %v1182_v3 }
0x1323   :  { %1231 = vrot.lane.b32.xlu0 %v1214_v2, %s1656_s1 }
0x1324   :  { %v1184_v22 = vadd.f32 %v1569_v20, %v1183_v21 }
0x1326   :  { %v1188_v24 = vsel %vm1187_vm4, %v1569_v20, %v1184_v22 }
0x1327   :  { %v1193_v29 = vsel %vm1190_vm6, %v1192_v25, %v1188_v24 }
0x1328   :  { %v1196_v33 = vmul.f32 %v1193_v29, %v1089_v35 }
0x1385   :  { %v1199_v28 = vpop.permute.xlu0 %1198 }
0x1386   :  { %v1201_v30 = vmul.f32 %v1199_v28, %v1193_v29 }
0x1388   :  { %1203 = vrot.lane.b32.xlu1 %v1201_v30, %s1656_s1 }
0x138d   :  { %v1234_v49 = vpop.permute.xlu0 %1233 }
0x138e   :  { %1414 = vmatmul.msk.bf16.vlgmr.msra.gmra.mxu3 %vm219_vm5, %v1234_v49 }
0x1390   :  { %1229 = vrot.lane.b32.xlu1 %v1213_v32, %s1656_s1 }
0x1395   :  { %v1232_v44 = vpop.permute.xlu0 %1231 }
0x13fa   :  { %v1204_v36 = vpop.permute.xlu1 %1203 }
0x13fb   :  { %v1206_v37 = vadd.f32 %v1204_v36, %v1196_v33 }
0x13fd   :  { %1570 = vtanh.f32 %v1206_v37 }
0x1402   :  { %v1230_v40 = vpop.permute.xlu1 %1229 }
0x1403   :  { %v1571_v42 = vpop.eup %1570  ;;  %1412 = vmatmul.msk.bf16.vlgmr.msra.gmra.mxu0 %vm219_vm5, %v1230_v40 }
0x1404   :  { %1209 = vrot.lane.b32.xlu2 %v1571_v42, %s1653_s13  ;;  %s1302_s13 = sshll.u32 %s1658_s7, 4  ;;  %s1303_s13 = int_to_ptr.vmem [resolvable:$true] %s1302_s13 }
0x1411   :  { %v1280_v45 = vpop.f32.mrf.mxu3 }
0x1412   :  { %v1281_v34 = vadd.f32 %v1443_v43, %v1280_v45 }
0x1413   :  { %1413 = vmatmul.msk.bf16.gmra.mxu0 %vm219_vm5, %v1232_v44 }
0x1414   :  { %1294 = vst [vmem:[#allocation7 + $0x20] sm:$0xff] %v1281_v34 }
0x1419   :  { %v1282_v46 = vpop.f32.mrf.mxu3 }
0x141a   :  { %v1283_v50 = vadd.f32 %v1443_v43, %v1282_v46 }
0x141c   :  { %1295 = vst [vmem:[#allocation7 + $0x28] sm:$0xff] %v1283_v50 }
0x145e   :  { %v1210_v51 = vpop.permute.xlu2 %1209 }
0x145f   :  { %v1212_v53 = vmul.f32 %v1210_v51, %v1193_v29 }
0x1461   :  { %v1216_v54 = vpack.c.bf16 %v1212_v53, %v2013_v6 }
0x1463   :  { %1235 = vrot.lane.b32.xlu2 %v1216_v54, %s1656_s1 }
0x1480   :  { %v1270_v55 = vpop.f32.mrf.mxu0 }
0x1481   :  { %v1271_v57 = vadd.f32 %v1443_v43, %v1270_v55 }
0x1483   :  { %1290 = vst [vmem:[#allocation7] sm:$0xff] %v1271_v57 }
0x1488   :  { %v1272_v58 = vpop.f32.mrf.mxu0 }
0x1489   :  { %v1273_v59 = vadd.f32 %v1443_v43, %v1272_v58 }
0x148b   :  { %1291 = vst [vmem:[#allocation7 + $0x8] sm:$0xff] %v1273_v59 }
0x1490   :  { %v1275_v60 = vpop.f32.mrf.mxu0 }
0x1491   :  { %v1276_v61 = vadd.f32 %v1443_v43, %v1275_v60 }
0x1493   :  { %1292 = vst [vmem:[#allocation7 + $0x10] sm:$0xff] %v1276_v61 }
0x1498   :  { %v1277_v62 = vpop.f32.mrf.mxu0 }
0x1499   :  { %v1278_v63 = vadd.f32 %v1443_v43, %v1277_v62 }
0x149b   :  { %1293 = vst [vmem:[#allocation7 + $0x18] sm:$0xff] %v1278_v63 }
0x14bd   :  { %v1236_v4 = vpop.permute.xlu2 %1235 }
0x14be   :  { %1415 = vmatmul.msk.bf16.gmra.mxu3 %vm219_vm5, %v1236_v4 }
0x1541   :  { %v1285_v5 = vpop.f32.mrf.mxu3 }
0x1542   :  { %v1286_v7 = vadd.f32 %v1443_v43, %v1285_v5 }
0x1544   :  { %1296 = vst [vmem:[#allocation7 + $0x30] sm:$0xff] %v1286_v7 }
0x1549   :  { %v1287_v52 = vpop.f32.mrf.mxu3 }
0x154a   :  { %v1288_v35 = vadd.f32 %v1443_v43, %v1287_v52 }
0x154c   :  { %1297 = vst [vmem:[#allocation7 + $0x38] sm:$0xff] %v1288_v35 }
0x154d   :  { %1310 = dma.vmem_to_hbm [thread:$0]  %s1303_s13, 1024, %s1305_s25, [#allocation4], %s1659_s26, %s1659_s26, %s1660_s27  }
0x154e   :  { %1650 = dma.done.wait [#allocation4], 1024  }
0x154f   :  { %1651 = vsyncadd [#allocation4], 4294966272 }
0x1550   :  { %1315 = vsyncpa [#allocation3], 1 }
0x1551   :  { %1316 = vsyncpa [#allocation6], 1 }
0x1552   :  { %1317 = vsyncpa [#allocation4], 1 }

</bundles_post_ra>
